<compile_context>
chip_gen: v7x
topology: tpu7x:2x2x1
jax: 0.10.0
libtpu: 0.0.40
codegen_flags: <defaults>
</compile_context>

<pallas_src>
import jax
import jax.numpy as jnp
from jax.experimental import pallas as pl
from jax.experimental.pallas import tpu as pltpu


def _round_up(n: int, m: int) -> int:
    return ((n + m - 1) // m) * m


def _cdiv(a: int, b: int) -> int:
    return -(-a // b)


def _lowrorth_kernel(x_ref, w_ref, b_ref, y_ref):
    # One fused MXU pass per time tile:
    #   y = x @ [U^T | U^T W2^T] + [b1 | W2 b1 + b2]
    # Both the "hidden" and "output" columns come out of the same matmul, so
    # the tiny rank-`hidden_size` dim never becomes the contraction dim and the
    # x tile is streamed from HBM only once.
    y = jnp.dot(x_ref[...], w_ref[...], preferred_element_type=jnp.float32)
    y_ref[...] = (y + b_ref[...]).astype(y_ref.dtype)


def lowrorth_forward(x, U, b1, W2, b2, *,
                     min_pallas_rows=512,
                     tile_t_cap=2048,
                     compute_dtype=jnp.bfloat16,
                     out_dtype=jnp.float32):
    """
    x  : [n_time, input_size]
    U  : [hidden_size, input_size]   (fc1.weight)
    b1 : [hidden_size]               (fc1.bias)
    W2 : [output_size, hidden_size]  (fc2.weight, orthogonal)
    b2 : [output_size]               (fc2.bias)
    Returns (hidden [n_time, hidden_size], output [n_time, output_size]).
    """
    n_time, input_size = x.shape
    hidden_size = U.shape[0]
    output_size = W2.shape[0]
    f32 = jnp.float32

    Uf = jnp.asarray(U, f32)
    b1f = jnp.asarray(b1, f32)
    W2f = jnp.asarray(W2, f32)
    b2f = jnp.asarray(b2, f32)

    # ---- tiny-problem fallback: pallas_call launch + 128-lane padding costs
    # more than the matmul itself for a handful of rows. --------------------
    if n_time < min_pallas_rows:
        hidden = x.astype(f32) @ Uf.T + b1f
        output = hidden @ W2f.T + b2f
        return hidden.astype(out_dtype), output.astype(out_dtype)

    # ---- lane-dense feature layout -----------------------------------------
    # hidden columns occupy [0, hw); output columns occupy [hw, hw+output_size).
    # hw is a multiple of 128 so both slices are lane-aligned; the combined
    # width is padded to a multiple of 256 to fill the v6e/v7x MXU result width.
    hw = _round_up(hidden_size, 128)
    total = _round_up(hw + _round_up(output_size, 128), 256)

    # Contraction dim: pad to a multiple of 128 only when it is already large
    # (for small In the kernel is writeback-bound and padding just adds traffic).
    if input_size > 128 and input_size % 128 != 0:
        in_pad = _round_up(input_size, 128)
    else:
        in_pad = input_size

    cbytes = jnp.dtype(compute_dtype).itemsize
    obytes = jnp.dtype(out_dtype).itemsize

    # ---- generation-aware VMEM budget & time tile ---------------------------
    try:
        vmem_cap = int(pltpu.get_tpu_info().vmem_capacity_bytes)
    except Exception:
        vmem_cap = 64 << 20  # conservative (v7x per-TC) default
    budget = int(vmem_cap * 0.75)

    # Resident weight/bias blocks counted 2x: the pipeline may double-buffer
    # even constant-index blocks.
    fixed_bytes = 2 * in_pad * total * cbytes + 2 * total * 4
    per_row = 2 * in_pad * cbytes + 2 * total * obytes   # x + y, double-buffered

    tile_fit = (budget - fixed_bytes) // max(per_row, 1)
    tile_t = max(16, min(tile_t_cap, (int(tile_fit) // 16) * 16))
    if n_time <= tile_t:
        tile_t = _round_up(n_time, 16)
        t_pad = tile_t
    else:
        # Balance the steps so trailing padding stays < 16 rows per step.
        n_steps = _cdiv(n_time, tile_t)
        tile_t = _round_up(_cdiv(n_time, n_steps), 16)
        t_pad = n_steps * tile_t

    # ---- fold + concatenate weights / biases (hoisted by jit) ---------------
    wc = Uf.T @ W2f.T                    # [In, Out] folded fc2 weight
    b2_eff = b2f + W2f @ b1f             # [Out]     folded fc2 bias

    w_cat = jnp.zeros((in_pad, total), f32)
    w_cat = w_cat.at[:input_size, :hidden_size].set(Uf.T)
    w_cat = w_cat.at[:input_size, hw:hw + output_size].set(wc)
    w_cat = w_cat.astype(compute_dtype)

    b_cat = jnp.zeros((1, total), f32)
    b_cat = b_cat.at[0, :hidden_size].set(b1f)
    b_cat = b_cat.at[0, hw:hw + output_size].set(b2_eff)

    xc = jnp.asarray(x, compute_dtype)
    if t_pad == n_time and in_pad == input_size:
        xp = xc
    else:
        xp = jnp.zeros((t_pad, in_pad), compute_dtype).at[:n_time, :input_size].set(xc)

    # ---- VMEM limit & cost estimate -----------------------------------------
    vmem_est = (2 * tile_t * in_pad * cbytes          # x tile, double-buffered
                + 2 * tile_t * total * obytes         # y tile, double-buffered
                + fixed_bytes)                        # resident weights + bias (2x)
    vmem_limit = int(min(max(2 * vmem_est, 8 << 20), int(0.9 * vmem_cap)))
    vmem_limit = max(vmem_limit, min(vmem_est + (1 << 20), int(0.9 * vmem_cap)))

    cost = pl.CostEstimate(
        flops=2 * t_pad * in_pad * total,
        transcendentals=0,
        bytes_accessed=(t_pad * in_pad * cbytes
                        + in_pad * total * cbytes
                        + total * 4
                        + t_pad * total * obytes),
    )

    y_p = pl.pallas_call(
        _lowrorth_kernel,
        out_shape=jax.ShapeDtypeStruct((t_pad, total), out_dtype),
        grid=(t_pad // tile_t,),
        in_specs=[
            pl.BlockSpec((tile_t, in_pad), lambda i: (i, 0)),   # x tile
            pl.BlockSpec((in_pad, total), lambda i: (0, 0)),    # fused weight (resident)
            pl.BlockSpec((1, total), lambda i: (0, 0)),         # fused bias (resident)
        ],
        out_specs=pl.BlockSpec((tile_t, total), lambda i: (i, 0)),
        compiler_params=pltpu.CompilerParams(
            dimension_semantics=("parallel",),
            vmem_limit_bytes=vmem_limit,
        ),
        cost_estimate=cost,
    )(xp, w_cat, b_cat)

    hidden = y_p[:n_time, :hidden_size].astype(out_dtype)
    output = y_p[:n_time, hw:hw + output_size].astype(out_dtype)
    return hidden, output


def _orthogonal(key, rows, cols):
    """Deterministic orthonormal matrix via QR (stand-in for geotorch)."""
    a = jax.random.normal(key, (max(rows, cols), min(rows, cols)), jnp.float32)
    q, _ = jnp.linalg.qr(a)
    if rows <= cols:
        return q[:cols, :rows].T            # [rows, cols], orthonormal rows
    return q[:rows, :cols]                  # [rows, cols], orthonormal cols


if __name__ == "__main__":
    # Shapes consistent with the module: x is [n_time, input_size].
    # n_time large enough to exercise the Pallas path (tiny n_time takes the
    # XLA fallback, also checked below).
    n_time = 1024
    input_size = 16
    output_size = 16           # == input_size, so fc1.bias = -U_init @ b_init
    hidden_size = 4

    key = jax.random.PRNGKey(0)
    k_x, k_u, k_b, k_w2 = jax.random.split(key, 4)

    x = jax.random.normal(k_x, (n_time, input_size), jnp.float32)

    # U_init: [hidden_size, input_size] with orthonormal rows (typical SSA init).
    U_init = _orthogonal(k_u, hidden_size, input_size)
    # b_init: [output_size]
    b_init = 0.1 * jax.random.normal(k_b, (output_size,), jnp.float32)
    # fc1 bias = -U_init @ b_init  (since input_size == output_size)
    b1 = -(U_init @ b_init)
    # fc2 weight: orthogonal [output_size, hidden_size] (geotorch stand-in)
    W2 = _orthogonal(k_w2, output_size, hidden_size)
    b2 = b_init

    # jit so the weight fold/concat/pad/cast glue fuses and is hoisted by XLA.
    fwd = jax.jit(lowrorth_forward,
                  static_argnames=("min_pallas_rows", "tile_t_cap",
                                   "compute_dtype", "out_dtype"))

    hidden, output = fwd(x, U_init, b1, W2, b2)
    jax.block_until_ready((hidden, output))

    # Pure-JAX f32 reference (bf16 MXU operands -> loosened tolerance).
    hidden_ref = x @ U_init.T + b1
    output_ref = hidden_ref @ W2.T + b2
    assert hidden.shape == (n_time, hidden_size)
    assert output.shape == (n_time, output_size)
    assert jnp.allclose(hidden, hidden_ref, atol=5e-2, rtol=5e-2), "hidden mismatch"
    assert jnp.allclose(output, output_ref, atol=5e-2, rtol=5e-2), "output mismatch"

    # Tiny-problem XLA fallback path (below min_pallas_rows).
    x_small = x[:8]
    h_s, o_s = fwd(x_small, U_init, b1, W2, b2)
    jax.block_until_ready((h_s, o_s))
    assert h_s.shape == (8, hidden_size) and o_s.shape == (8, output_size)
    assert jnp.allclose(h_s, hidden_ref[:8], atol=5e-2, rtol=5e-2), "small hidden mismatch"
    assert jnp.allclose(o_s, output_ref[:8], atol=5e-2, rtol=5e-2), "small output mismatch"

    print("KERNEL_OK")
</pallas_src>

<mosaic_0001>
module attributes {stable_mosaic.version = 11 : i64} {
  func.func @_lowrorth_kernel(%arg0: i32, %arg1: memref<1024x16xbf16, #tpu.memory_space<vmem>>, %arg2: memref<16x256xbf16, #tpu.memory_space<vmem>>, %arg3: memref<1x256xf32, #tpu.memory_space<vmem>>, %arg4: memref<1024x256xf32, #tpu.memory_space<vmem>>) attributes {dimension_semantics = [#tpu.dimension_semantics<parallel>], iteration_bounds = array<i64: 1>, scalar_prefetch = 0 : i64, scratch_operands = 0 : i64, tpu.core_type = #tpu.core_type<tc>, window_params = [{transform_indices = @transform_0, window_bounds = array<i64: 1024, 16>}, {pipeline_mode = #tpu.pipeline_mode<synchronous>, transform_indices = @transform_1, window_bounds = array<i64: 16, 256>}, {pipeline_mode = #tpu.pipeline_mode<synchronous>, transform_indices = @transform_2, window_bounds = array<i64: 1, 256>}, {transform_indices = @transform_3, window_bounds = array<i64: 1024, 256>}]} {
    %c0 = arith.constant 0 : index
    %c0_0 = arith.constant 0 : index
    %0 = vector.load %arg1[%c0, %c0_0] : memref<1024x16xbf16, #tpu.memory_space<vmem>>, vector<1024x16xbf16>
    %c0_1 = arith.constant 0 : index
    %c0_2 = arith.constant 0 : index
    %1 = vector.load %arg2[%c0_1, %c0_2] : memref<16x256xbf16, #tpu.memory_space<vmem>>, vector<16x256xbf16>
    %cst = arith.constant dense<0.000000e+00> : vector<1024x256xf32>
    %2 = tpu.matmul %0, %1, %cst {dimension_numbers = #tpu.dot_dimension_numbers<[1], [0], [0], [1], [0, 0, 1, 1], [], []>} : vector<1024x16xbf16>, vector<16x256xbf16>, vector<1024x256xf32> -> vector<1024x256xf32>
    %c0_3 = arith.constant 0 : index
    %c0_4 = arith.constant 0 : index
    %3 = vector.load %arg3[%c0_3, %c0_4] : memref<1x256xf32, #tpu.memory_space<vmem>>, vector<1x256xf32>
    %4 = vector.broadcast %3 : vector<1x256xf32> to vector<1024x256xf32>
    %5 = arith.addf %2, %4 : vector<1024x256xf32>
    %c0_5 = arith.constant 0 : index
    %c0_6 = arith.constant 0 : index
    %6 = vector.load %arg4[%c0_5, %c0_6] : memref<1024x256xf32, #tpu.memory_space<vmem>>, vector<1024x256xf32>
    tpu.vector_store %arg4[%c0_5, %c0_6], %5 {strides = array<i32>} : memref<1024x256xf32, #tpu.memory_space<vmem>>, vector<1024x256xf32>,
    return
  }
  func.func @transform_0(%arg0: i32) -> (i32, i32) {
    %c0_i32 = arith.constant 0 : i32
    %c0_i32_0 = arith.constant 0 : i32
    return %arg0, %c0_i32 : i32, i32
  }
  func.func @transform_1(%arg0: i32) -> (i32, i32) {
    %c0_i32 = arith.constant 0 : i32
    %c0_i32_0 = arith.constant 0 : i32
    %c0_i32_1 = arith.constant 0 : i32
    return %c0_i32, %c0_i32_0 : i32, i32
  }
  func.func @transform_2(%arg0: i32) -> (i32, i32) {
    %c0_i32 = arith.constant 0 : i32
    %c0_i32_0 = arith.constant 0 : i32
    %c0_i32_1 = arith.constant 0 : i32
    return %c0_i32, %c0_i32_0 : i32, i32
  }
  func.func @transform_3(%arg0: i32) -> (i32, i32) {
    %c0_i32 = arith.constant 0 : i32
    %c0_i32_0 = arith.constant 0 : i32
    return %arg0, %c0_i32 : i32, i32
  }
}

</mosaic_0001>

<bundles_post_ra>
// kernel: lowrorth_forward.1
= control target key start
LH: loop header
LB: loop body
LE: loop exit
PB: predicated region body
PF: predicated region fallthrough
CT: control target
= control target key end

     0   :  { %v1813_v1 = vmov 0   ;;  %vm487_vm0 = vcmask 130048   ;;  %v147_v55 = vlaneseq  ;;  %s3191_s1 = inlined_call_operand.vmem [shape: bf16[16,256], index: 1, kind: input, shape index: {}]   ;;  %s3192_s0 = inlined_call_operand.vmem [shape: bf16[1024,16], index: 0, kind: input, shape index: {}]   ;;  %s3193_s2 = inlined_call_operand.vmem [shape: f32[1,256], index: 2, kind: input, shape index: {}]   ;;  %s3194_s3 = inlined_call_operand.vmem [shape: f32[1024,256], index: 3, kind: output, shape index: {}]  }
   0x1   :  { %v1746_v0 = vld [vmem:[%s3191_s1 + $0x4] ss:$8 sps:$4 sm:$0xff]   ;;  %712 = vmatprep.mubr.bf16.mxu0 %v1813_v1  ;;  %1032 = vmatprep.mubr.bf16.mxu1 %v1813_v1  ;;  %v1748_v2 = vld [vmem:[%s3191_s1] ss:$8 sps:$4 sm:$0xff]   ;;  %v1753_v7 = vld [vmem:[%s3192_s0 + $0x10] sm:$0xff]  }
   0x2   :  { %680 = vmatprep.subr.bf16.mxu0 %v1746_v0  ;;  %1743 = vmatprep.subr.bf16.mxu1 %v1746_v0  ;;  %v1749_v3 = vld [vmem:[%s3192_s0] sm:$0xff]   ;;  %v1751_v5 = vld [vmem:[%s3192_s0 + $0x8] sm:$0xff]   ;;  %v1754_v8 = vld [vmem:[%s3192_s0 + $0x110] sm:$0xff]   ;;  %v148_v56 = vshrl.u32 %v147_v55, 7 }
   0x3   :  { %681 = vmatpush1.bf16.msra.mxu0 %v1748_v2  ;;  %1744 = vmatpush1.bf16.msra.mxu1 %v1748_v2  ;;  %v1750_v4 = vld [vmem:[%s3192_s0 + $0x100] sm:$0xff]   ;;  %v1752_v6 = vld [vmem:[%s3192_s0 + $0x108] sm:$0xff]   ;;  %v1755_v9 = vld [vmem:[%s3192_s0 + $0x18] sm:$0xff]  }
   0x4   :  { %v1756_v10 = vld [vmem:[%s3192_s0 + $0x118] sm:$0xff]   ;;  %v1757_v11 = vld [vmem:[%s3192_s0 + $0x20] sm:$0xff]   ;;  %v1759_v13 = vld [vmem:[%s3192_s0 + $0x28] sm:$0xff]   ;;  %v149_v59 = vsub.s32 0, %v148_v56  ;;  %v153_v61 = vsub.s32 1, %v148_v56 }
   0x5   :  { %v1758_v12 = vld [vmem:[%s3192_s0 + $0x120] sm:$0xff]   ;;  %v1760_v14 = vld [vmem:[%s3192_s0 + $0x128] sm:$0xff]   ;;  %v1761_v15 = vld [vmem:[%s3192_s0 + $0x30] sm:$0xff]  }
   0x6   :  { %1679 = vmatmul.mubr.msk.bf16.vlgmr.msra.gmra.mrb[0].mxu0 %vm487_vm0, %v1749_v3  ;;  %1711 = vmatmul.mubr.msk.bf16.vlgmr.msra.gmra.mrb[0].mxu1 %vm487_vm0, %v1750_v4  ;;  %v1762_v16 = vld [vmem:[%s3192_s0 + $0x130] sm:$0xff]   ;;  %v1763_v17 = vld [vmem:[%s3192_s0 + $0x38] sm:$0xff]   ;;  %v1765_v19 = vld [vmem:[%s3192_s0 + $0x40] sm:$0xff]  }
   0x7   :  { %722 = vmatprep.mubr.bf16.mxu0 %v1813_v1  ;;  %1042 = vmatprep.mubr.bf16.mxu1 %v1813_v1  ;;  %v1764_v18 = vld [vmem:[%s3192_s0 + $0x138] sm:$0xff]   ;;  %v1766_v20 = vld [vmem:[%s3192_s0 + $0x140] sm:$0xff]   ;;  %v1767_v21 = vld [vmem:[%s3192_s0 + $0x48] sm:$0xff]  }
   0x8   :  { %v1768_v22 = vld [vmem:[%s3192_s0 + $0x148] sm:$0xff]   ;;  %v1769_v23 = vld [vmem:[%s3192_s0 + $0x50] sm:$0xff]   ;;  %v1771_v25 = vld [vmem:[%s3192_s0 + $0x58] sm:$0xff]  }
   0x9   :  { %v1770_v24 = vld [vmem:[%s3192_s0 + $0x150] sm:$0xff]   ;;  %v1772_v26 = vld [vmem:[%s3192_s0 + $0x158] sm:$0xff]   ;;  %v1773_v27 = vld [vmem:[%s3192_s0 + $0x60] sm:$0xff]  }
   0xa   :  { %v1774_v28 = vld [vmem:[%s3192_s0 + $0x160] sm:$0xff]   ;;  %v1775_v29 = vld [vmem:[%s3192_s0 + $0x68] sm:$0xff]   ;;  %v1777_v31 = vld [vmem:[%s3192_s0 + $0x70] sm:$0xff]  }
   0xb   :  { %v1776_v30 = vld [vmem:[%s3192_s0 + $0x168] sm:$0xff]   ;;  %v1778_v32 = vld [vmem:[%s3192_s0 + $0x170] sm:$0xff]   ;;  %v1779_v33 = vld [vmem:[%s3192_s0 + $0x78] sm:$0xff]  }
   0xc   :  { %v1780_v34 = vld [vmem:[%s3192_s0 + $0x178] sm:$0xff]   ;;  %v1781_v35 = vld [vmem:[%s3192_s0 + $0x80] sm:$0xff]   ;;  %v1783_v37 = vld [vmem:[%s3192_s0 + $0x88] sm:$0xff]  }
   0xd   :  { %v1782_v36 = vld [vmem:[%s3192_s0 + $0x180] sm:$0xff]   ;;  %v1784_v38 = vld [vmem:[%s3192_s0 + $0x188] sm:$0xff]   ;;  %v1785_v39 = vld [vmem:[%s3192_s0 + $0x90] sm:$0xff]  }
   0xe   :  { %1680 = vmatmul.mubr.msk.bf16.gmra.mrb[4].mxu0 %vm487_vm0, %v1751_v5  ;;  %1712 = vmatmul.mubr.msk.bf16.gmra.mrb[4].mxu1 %vm487_vm0, %v1752_v6  ;;  %v1786_v40 = vld [vmem:[%s3192_s0 + $0x190] sm:$0xff]   ;;  %v1787_v41 = vld [vmem:[%s3192_s0 + $0x98] sm:$0xff]   ;;  %v1789_v43 = vld [vmem:[%s3192_s0 + $0xa0] sm:$0xff]  }
   0xf   :  { %732 = vmatprep.mubr.bf16.mxu0 %v1813_v1  ;;  %1052 = vmatprep.mubr.bf16.mxu1 %v1813_v1  ;;  %v1788_v42 = vld [vmem:[%s3192_s0 + $0x198] sm:$0xff]   ;;  %v1790_v44 = vld [vmem:[%s3192_s0 + $0x1a0] sm:$0xff]   ;;  %v1791_v45 = vld [vmem:[%s3192_s0 + $0xa8] sm:$0xff]  }
  0x10   :  { %v1792_v46 = vld [vmem:[%s3192_s0 + $0x1a8] sm:$0xff]   ;;  %v1793_v47 = vld [vmem:[%s3192_s0 + $0xb0] sm:$0xff]   ;;  %v1795_v49 = vld [vmem:[%s3192_s0 + $0xb8] sm:$0xff]  }
  0x11   :  { %v1794_v48 = vld [vmem:[%s3192_s0 + $0x1b0] sm:$0xff]   ;;  %v1796_v50 = vld [vmem:[%s3192_s0 + $0x1b8] sm:$0xff]   ;;  %v1797_v51 = vld [vmem:[%s3192_s0 + $0xc0] sm:$0xff]  }
  0x12   :  { %v1798_v52 = vld [vmem:[%s3192_s0 + $0x1c0] sm:$0xff]   ;;  %v1799_v53 = vld [vmem:[%s3192_s0 + $0xc8] sm:$0xff]   ;;  %v1801_v57 = vld [vmem:[%s3192_s0 + $0xd0] sm:$0xff]  }
  0x13   :  { %v1800_v54 = vld [vmem:[%s3192_s0 + $0x1c8] sm:$0xff]   ;;  %v1802_v58 = vld [vmem:[%s3192_s0 + $0x1d0] sm:$0xff]   ;;  %v145_v60 = vld [vmem:[%s3193_s2] sm:$0x3] }
  0x14   :  { %v2113_v62 = vrot.slane %v145_v60, %v149_v59  ;;  %v2115_v63 = vrot.slane %v145_v60, %v153_v61  ;;  %v1809_v61 = vld [vmem:[%s3192_s0 + $0xf0] sm:$0xff]  }
  0x16   :  { %1681 = vmatmul.mubr.msk.bf16.gmra.mrb[8].mxu0 %vm487_vm0, %v1753_v7  ;;  %1713 = vmatmul.mubr.msk.bf16.gmra.mrb[8].mxu1 %vm487_vm0, %v1754_v8  ;;  %v1803_v7 = vld [vmem:[%s3192_s0 + $0xd8] sm:$0xff]  }
  0x17   :  { %742 = vmatprep.mubr.bf16.mxu0 %v1813_v1  ;;  %1062 = vmatprep.mubr.bf16.mxu1 %v1813_v1  ;;  %v1804_v8 = vld [vmem:[%s3192_s0 + $0x1d8] sm:$0xff]  }
  0x1e   :  { %1682 = vmatmul.mubr.msk.bf16.gmra.mrb[12].mxu0 %vm487_vm0, %v1755_v9  ;;  %1714 = vmatmul.mubr.msk.bf16.gmra.mrb[12].mxu1 %vm487_vm0, %v1756_v10 }
  0x1f   :  { %752 = vmatprep.mubr.bf16.mxu0 %v1813_v1  ;;  %1072 = vmatprep.mubr.bf16.mxu1 %v1813_v1 }
  0x26   :  { %1683 = vmatmul.mubr.msk.bf16.gmra.mrb[16].mxu0 %vm487_vm0, %v1757_v11  ;;  %1715 = vmatmul.mubr.msk.bf16.gmra.mrb[16].mxu1 %vm487_vm0, %v1758_v12 }
  0x27   :  { %762 = vmatprep.mubr.bf16.mxu0 %v1813_v1  ;;  %1082 = vmatprep.mubr.bf16.mxu1 %v1813_v1 }
  0x2e   :  { %1684 = vmatmul.mubr.msk.bf16.gmra.mrb[20].mxu0 %vm487_vm0, %v1759_v13  ;;  %1716 = vmatmul.mubr.msk.bf16.gmra.mrb[20].mxu1 %vm487_vm0, %v1760_v14 }
  0x2f   :  { %772 = vmatprep.mubr.bf16.mxu0 %v1813_v1  ;;  %1092 = vmatprep.mubr.bf16.mxu1 %v1813_v1 }
  0x36   :  { %1685 = vmatmul.mubr.msk.bf16.gmra.mrb[24].mxu0 %vm487_vm0, %v1761_v15  ;;  %1717 = vmatmul.mubr.msk.bf16.gmra.mrb[24].mxu1 %vm487_vm0, %v1762_v16 }
  0x37   :  { %782 = vmatprep.mubr.bf16.mxu0 %v1813_v1  ;;  %1102 = vmatprep.mubr.bf16.mxu1 %v1813_v1 }
  0x3e   :  { %1686 = vmatmul.mubr.msk.bf16.gmra.mrb[28].mxu0 %vm487_vm0, %v1763_v17  ;;  %1718 = vmatmul.mubr.msk.bf16.gmra.mrb[28].mxu1 %vm487_vm0, %v1764_v18 }
  0x3f   :  { %792 = vmatprep.mubr.bf16.mxu0 %v1813_v1  ;;  %1112 = vmatprep.mubr.bf16.mxu1 %v1813_v1 }
  0x46   :  { %1687 = vmatmul.mubr.msk.bf16.gmra.mrb[32].mxu0 %vm487_vm0, %v1765_v19  ;;  %1719 = vmatmul.mubr.msk.bf16.gmra.mrb[32].mxu1 %vm487_vm0, %v1766_v20 }
  0x47   :  { %802 = vmatprep.mubr.bf16.mxu0 %v1813_v1  ;;  %1122 = vmatprep.mubr.bf16.mxu1 %v1813_v1 }
  0x4e   :  { %1688 = vmatmul.mubr.msk.bf16.gmra.mrb[36].mxu0 %vm487_vm0, %v1767_v21  ;;  %1720 = vmatmul.mubr.msk.bf16.gmra.mrb[36].mxu1 %vm487_vm0, %v1768_v22 }
  0x4f   :  { %812 = vmatprep.mubr.bf16.mxu0 %v1813_v1  ;;  %1132 = vmatprep.mubr.bf16.mxu1 %v1813_v1 }
  0x56   :  { %1689 = vmatmul.mubr.msk.bf16.gmra.mrb[40].mxu0 %vm487_vm0, %v1769_v23  ;;  %1721 = vmatmul.mubr.msk.bf16.gmra.mrb[40].mxu1 %vm487_vm0, %v1770_v24 }
  0x57   :  { %822 = vmatprep.mubr.bf16.mxu0 %v1813_v1  ;;  %1142 = vmatprep.mubr.bf16.mxu1 %v1813_v1 }
  0x5e   :  { %1690 = vmatmul.mubr.msk.bf16.gmra.mrb[44].mxu0 %vm487_vm0, %v1771_v25  ;;  %1722 = vmatmul.mubr.msk.bf16.gmra.mrb[44].mxu1 %vm487_vm0, %v1772_v26  ;;  %v1805_v25 = vld [vmem:[%s3192_s0 + $0xe0] sm:$0xff]  }
  0x5f   :  { %832 = vmatprep.mubr.bf16.mxu0 %v1813_v1  ;;  %1152 = vmatprep.mubr.bf16.mxu1 %v1813_v1  ;;  %v1806_v26 = vld [vmem:[%s3192_s0 + $0x1e0] sm:$0xff]  }
  0x66   :  { %1691 = vmatmul.mubr.msk.bf16.gmra.mrb[48].mxu0 %vm487_vm0, %v1773_v27  ;;  %1723 = vmatmul.mubr.msk.bf16.gmra.mrb[48].mxu1 %vm487_vm0, %v1774_v28 }
  0x67   :  { %842 = vmatprep.mubr.bf16.mxu0 %v1813_v1  ;;  %1162 = vmatprep.mubr.bf16.mxu1 %v1813_v1 }
  0x6e   :  { %1692 = vmatmul.mubr.msk.bf16.gmra.mrb[52].mxu0 %vm487_vm0, %v1775_v29  ;;  %1724 = vmatmul.mubr.msk.bf16.gmra.mrb[52].mxu1 %vm487_vm0, %v1776_v30 }
  0x6f   :  { %852 = vmatprep.mubr.bf16.mxu0 %v1813_v1  ;;  %1172 = vmatprep.mubr.bf16.mxu1 %v1813_v1 }
  0x76   :  { %1693 = vmatmul.mubr.msk.bf16.gmra.mrb[56].mxu0 %vm487_vm0, %v1777_v31  ;;  %1725 = vmatmul.mubr.msk.bf16.gmra.mrb[56].mxu1 %vm487_vm0, %v1778_v32 }
  0x77   :  { %862 = vmatprep.mubr.bf16.mxu0 %v1813_v1  ;;  %1182 = vmatprep.mubr.bf16.mxu1 %v1813_v1 }
  0x7e   :  { %1694 = vmatmul.mubr.msk.bf16.gmra.mrb[60].mxu0 %vm487_vm0, %v1779_v33  ;;  %1726 = vmatmul.mubr.msk.bf16.gmra.mrb[60].mxu1 %vm487_vm0, %v1780_v34 }
  0x7f   :  { %872 = vmatprep.mubr.bf16.mxu0 %v1813_v1  ;;  %1192 = vmatprep.mubr.bf16.mxu1 %v1813_v1 }
  0x86   :  { %1695 = vmatmul.mubr.msk.bf16.gmra.mrb[64].mxu0 %vm487_vm0, %v1781_v35  ;;  %1727 = vmatmul.mubr.msk.bf16.gmra.mrb[64].mxu1 %vm487_vm0, %v1782_v36 }
  0x87   :  { %882 = vmatprep.mubr.bf16.mxu0 %v1813_v1  ;;  %1202 = vmatprep.mubr.bf16.mxu1 %v1813_v1 }
  0x8e   :  { %1696 = vmatmul.mubr.msk.bf16.gmra.mrb[68].mxu0 %vm487_vm0, %v1783_v37  ;;  %1728 = vmatmul.mubr.msk.bf16.gmra.mrb[68].mxu1 %vm487_vm0, %v1784_v38 }
  0x8f   :  { %892 = vmatprep.mubr.bf16.mxu0 %v1813_v1  ;;  %1212 = vmatprep.mubr.bf16.mxu1 %v1813_v1 }
  0x96   :  { %1697 = vmatmul.mubr.msk.bf16.gmra.mrb[72].mxu0 %vm487_vm0, %v1785_v39  ;;  %1729 = vmatmul.mubr.msk.bf16.gmra.mrb[72].mxu1 %vm487_vm0, %v1786_v40 }
  0x97   :  { %902 = vmatprep.mubr.bf16.mxu0 %v1813_v1  ;;  %1222 = vmatprep.mubr.bf16.mxu1 %v1813_v1 }
  0x9e   :  { %1698 = vmatmul.mubr.msk.bf16.gmra.mrb[76].mxu0 %vm487_vm0, %v1787_v41  ;;  %1730 = vmatmul.mubr.msk.bf16.gmra.mrb[76].mxu1 %vm487_vm0, %v1788_v42 }
  0x9f   :  { %912 = vmatprep.mubr.bf16.mxu0 %v1813_v1  ;;  %1232 = vmatprep.mubr.bf16.mxu1 %v1813_v1 }
  0xa6   :  { %1699 = vmatmul.mubr.msk.bf16.gmra.mrb[80].mxu0 %vm487_vm0, %v1789_v43  ;;  %1731 = vmatmul.mubr.msk.bf16.gmra.mrb[80].mxu1 %vm487_vm0, %v1790_v44  ;;  %v1807_v43 = vld [vmem:[%s3192_s0 + $0xe8] sm:$0xff]  }
  0xa7   :  { %922 = vmatprep.mubr.bf16.mxu0 %v1813_v1  ;;  %1242 = vmatprep.mubr.bf16.mxu1 %v1813_v1  ;;  %v1808_v44 = vld [vmem:[%s3192_s0 + $0x1e8] sm:$0xff]  }
  0xae   :  { %1700 = vmatmul.mubr.msk.bf16.gmra.mrb[84].mxu0 %vm487_vm0, %v1791_v45  ;;  %1732 = vmatmul.mubr.msk.bf16.gmra.mrb[84].mxu1 %vm487_vm0, %v1792_v46 }
  0xaf   :  { %932 = vmatprep.mubr.bf16.mxu0 %v1813_v1  ;;  %1252 = vmatprep.mubr.bf16.mxu1 %v1813_v1 }
  0xb6   :  { %1701 = vmatmul.mubr.msk.bf16.gmra.mrb[88].mxu0 %vm487_vm0, %v1793_v47  ;;  %1733 = vmatmul.mubr.msk.bf16.gmra.mrb[88].mxu1 %vm487_vm0, %v1794_v48 }
  0xb7   :  { %942 = vmatprep.mubr.bf16.mxu0 %v1813_v1  ;;  %1262 = vmatprep.mubr.bf16.mxu1 %v1813_v1 }
  0xbe   :  { %1702 = vmatmul.mubr.msk.bf16.gmra.mrb[92].mxu0 %vm487_vm0, %v1795_v49  ;;  %1734 = vmatmul.mubr.msk.bf16.gmra.mrb[92].mxu1 %vm487_vm0, %v1796_v50 }
  0xbf   :  { %952 = vmatprep.mubr.bf16.mxu0 %v1813_v1  ;;  %1272 = vmatprep.mubr.bf16.mxu1 %v1813_v1 }
  0xc6   :  { %1703 = vmatmul.mubr.msk.bf16.gmra.mrb[96].mxu0 %vm487_vm0, %v1797_v51  ;;  %1735 = vmatmul.mubr.msk.bf16.gmra.mrb[96].mxu1 %vm487_vm0, %v1798_v52 }
  0xc7   :  { %962 = vmatprep.mubr.bf16.mxu0 %v1813_v1  ;;  %1282 = vmatprep.mubr.bf16.mxu1 %v1813_v1 }
  0xce   :  { %1704 = vmatmul.mubr.msk.bf16.gmra.mrb[100].mxu0 %vm487_vm0, %v1799_v53  ;;  %1736 = vmatmul.mubr.msk.bf16.gmra.mrb[100].mxu1 %vm487_vm0, %v1800_v54 }
  0xcf   :  { %972 = vmatprep.mubr.bf16.mxu0 %v1813_v1  ;;  %1292 = vmatprep.mubr.bf16.mxu1 %v1813_v1 }
  0xd6   :  { %1705 = vmatmul.mubr.msk.bf16.gmra.mrb[104].mxu0 %vm487_vm0, %v1801_v57  ;;  %1737 = vmatmul.mubr.msk.bf16.gmra.mrb[104].mxu1 %vm487_vm0, %v1802_v58 }
  0xd7   :  { %982 = vmatprep.mubr.bf16.mxu0 %v1813_v1  ;;  %1302 = vmatprep.mubr.bf16.mxu1 %v1813_v1 }
  0xd9   :  { %v714_v0 = vpop.f32.mrb[0].mxu0  ;;  %v1034_v2 = vpop.f32.mrb[0].mxu1 }
  0xda   :  { %v715_v3 = vadd.f32 %v714_v0, %v2113_v62  ;;  %v1035_v4 = vadd.f32 %v1034_v2, %v2113_v62  ;;  %v716_v5 = vpop.f32.mrb[1].mxu0  ;;  %v1036_v6 = vpop.f32.mrb[1].mxu1  ;;  %v1810_v0 = vld [vmem:[%s3192_s0 + $0x1f0] sm:$0xff]  }
  0xdb   :  { %v717_v9 = vadd.f32 %v716_v5, %v2115_v63  ;;  %v1037_v10 = vadd.f32 %v1036_v6, %v2115_v63  ;;  %v718_v11 = vpop.f32.mrb[2].mxu0  ;;  %v1038_v12 = vpop.f32.mrb[2].mxu1 }
  0xdc   :  { %1353 = vst [vmem:[%s3194_s3] sm:$0xff] %v715_v3  ;;  %1481 = vst [vmem:[%s3194_s3 + $0x400] sm:$0xff] %v1035_v4  ;;  %v719_v13 = vadd.f32 %v718_v11, %v2113_v62  ;;  %v1039_v14 = vadd.f32 %v1038_v12, %v2113_v62  ;;  %v720_v15 = vpop.f32.mrb[3].mxu0  ;;  %v1040_v16 = vpop.f32.mrb[3].mxu1 }
  0xdd   :  { %1354 = vst [vmem:[%s3194_s3 + $0x8] sm:$0xff] %v717_v9  ;;  %1482 = vst [vmem:[%s3194_s3 + $0x408] sm:$0xff] %v1037_v10  ;;  %v721_v17 = vadd.f32 %v720_v15, %v2115_v63  ;;  %v1041_v18 = vadd.f32 %v1040_v16, %v2115_v63 }
  0xde   :  { %1355 = vst [vmem:[%s3194_s3 + $0x10] sm:$0xff] %v719_v13  ;;  %1483 = vst [vmem:[%s3194_s3 + $0x410] sm:$0xff] %v1039_v14  ;;  %1706 = vmatmul.mubr.msk.bf16.gmra.mrb[108].mxu0 %vm487_vm0, %v1803_v7  ;;  %1738 = vmatmul.mubr.msk.bf16.gmra.mrb[108].mxu1 %vm487_vm0, %v1804_v8 }
  0xdf   :  { %1356 = vst [vmem:[%s3194_s3 + $0x18] sm:$0xff] %v721_v17  ;;  %1484 = vst [vmem:[%s3194_s3 + $0x418] sm:$0xff] %v1041_v18  ;;  %992 = vmatprep.mubr.bf16.mxu0 %v1813_v1  ;;  %1312 = vmatprep.mubr.bf16.mxu1 %v1813_v1  ;;  %v1811_v18 = vld [vmem:[%s3192_s0 + $0xf8] sm:$0xff]  }
  0xe1   :  { %v724_v19 = vpop.f32.mrb[4].mxu0  ;;  %v1044_v20 = vpop.f32.mrb[4].mxu1 }
  0xe2   :  { %v725_v21 = vadd.f32 %v724_v19, %v2113_v62  ;;  %v1045_v22 = vadd.f32 %v1044_v20, %v2113_v62  ;;  %v726_v23 = vpop.f32.mrb[5].mxu0  ;;  %v1046_v24 = vpop.f32.mrb[5].mxu1  ;;  %v1812_v19 = vld [vmem:[%s3192_s0 + $0x1f8] sm:$0xff]  }
  0xe3   :  { %v727_v27 = vadd.f32 %v726_v23, %v2115_v63  ;;  %v1047_v28 = vadd.f32 %v1046_v24, %v2115_v63  ;;  %v728_v29 = vpop.f32.mrb[6].mxu0  ;;  %v1048_v30 = vpop.f32.mrb[6].mxu1 }
  0xe4   :  { %1357 = vst [vmem:[%s3194_s3 + $0x20] sm:$0xff] %v725_v21  ;;  %1485 = vst [vmem:[%s3194_s3 + $0x420] sm:$0xff] %v1045_v22  ;;  %v729_v31 = vadd.f32 %v728_v29, %v2113_v62  ;;  %v1049_v32 = vadd.f32 %v1048_v30, %v2113_v62  ;;  %v730_v33 = vpop.f32.mrb[7].mxu0  ;;  %v1050_v34 = vpop.f32.mrb[7].mxu1 }
  0xe5   :  { %1358 = vst [vmem:[%s3194_s3 + $0x28] sm:$0xff] %v727_v27  ;;  %1486 = vst [vmem:[%s3194_s3 + $0x428] sm:$0xff] %v1047_v28  ;;  %v731_v35 = vadd.f32 %v730_v33, %v2115_v63  ;;  %v1051_v36 = vadd.f32 %v1050_v34, %v2115_v63 }
  0xe6   :  { %1359 = vst [vmem:[%s3194_s3 + $0x30] sm:$0xff] %v729_v31  ;;  %1487 = vst [vmem:[%s3194_s3 + $0x430] sm:$0xff] %v1049_v32  ;;  %1707 = vmatmul.mubr.msk.bf16.gmra.mrb[112].mxu0 %vm487_vm0, %v1805_v25  ;;  %1739 = vmatmul.mubr.msk.bf16.gmra.mrb[112].mxu1 %vm487_vm0, %v1806_v26 }
  0xe7   :  { %1360 = vst [vmem:[%s3194_s3 + $0x38] sm:$0xff] %v731_v35  ;;  %1488 = vst [vmem:[%s3194_s3 + $0x438] sm:$0xff] %v1051_v36  ;;  %1002 = vmatprep.mubr.bf16.mxu0 %v1813_v1  ;;  %1322 = vmatprep.mubr.bf16.mxu1 %v1813_v1 }
  0xe9   :  { %v734_v37 = vpop.f32.mrb[8].mxu0  ;;  %v1054_v38 = vpop.f32.mrb[8].mxu1 }
  0xea   :  { %v735_v39 = vadd.f32 %v734_v37, %v2113_v62  ;;  %v1055_v40 = vadd.f32 %v1054_v38, %v2113_v62  ;;  %v736_v41 = vpop.f32.mrb[9].mxu0  ;;  %v1056_v42 = vpop.f32.mrb[9].mxu1 }
  0xeb   :  { %v737_v45 = vadd.f32 %v736_v41, %v2115_v63  ;;  %v1057_v46 = vadd.f32 %v1056_v42, %v2115_v63  ;;  %v738_v47 = vpop.f32.mrb[10].mxu0  ;;  %v1058_v48 = vpop.f32.mrb[10].mxu1 }
  0xec   :  { %1361 = vst [vmem:[%s3194_s3 + $0x40] sm:$0xff] %v735_v39  ;;  %1489 = vst [vmem:[%s3194_s3 + $0x440] sm:$0xff] %v1055_v40  ;;  %v739_v49 = vadd.f32 %v738_v47, %v2113_v62  ;;  %v1059_v50 = vadd.f32 %v1058_v48, %v2113_v62  ;;  %v740_v51 = vpop.f32.mrb[11].mxu0  ;;  %v1060_v52 = vpop.f32.mrb[11].mxu1 }
  0xed   :  { %1362 = vst [vmem:[%s3194_s3 + $0x48] sm:$0xff] %v737_v45  ;;  %1490 = vst [vmem:[%s3194_s3 + $0x448] sm:$0xff] %v1057_v46  ;;  %v741_v53 = vadd.f32 %v740_v51, %v2115_v63  ;;  %v1061_v54 = vadd.f32 %v1060_v52, %v2115_v63 }
  0xee   :  { %1363 = vst [vmem:[%s3194_s3 + $0x50] sm:$0xff] %v739_v49  ;;  %1491 = vst [vmem:[%s3194_s3 + $0x450] sm:$0xff] %v1059_v50  ;;  %1708 = vmatmul.mubr.msk.bf16.gmra.mrb[116].mxu0 %vm487_vm0, %v1807_v43  ;;  %1740 = vmatmul.mubr.msk.bf16.gmra.mrb[116].mxu1 %vm487_vm0, %v1808_v44 }
  0xef   :  { %1364 = vst [vmem:[%s3194_s3 + $0x58] sm:$0xff] %v741_v53  ;;  %1492 = vst [vmem:[%s3194_s3 + $0x458] sm:$0xff] %v1061_v54  ;;  %1012 = vmatprep.mubr.bf16.mxu0 %v1813_v1  ;;  %1332 = vmatprep.mubr.bf16.mxu1 %v1813_v1 }
  0xf1   :  { %v744_v55 = vpop.f32.mrb[12].mxu0  ;;  %v1064_v56 = vpop.f32.mrb[12].mxu1 }
  0xf2   :  { %v745_v57 = vadd.f32 %v744_v55, %v2113_v62  ;;  %v1065_v58 = vadd.f32 %v1064_v56, %v2113_v62  ;;  %v746_v59 = vpop.f32.mrb[13].mxu0  ;;  %v1066_v60 = vpop.f32.mrb[13].mxu1 }
  0xf3   :  { %v747_v2 = vadd.f32 %v746_v59, %v2115_v63  ;;  %v1067_v3 = vadd.f32 %v1066_v60, %v2115_v63  ;;  %v748_v4 = vpop.f32.mrb[14].mxu0  ;;  %v1068_v5 = vpop.f32.mrb[14].mxu1 }
  0xf4   :  { %1365 = vst [vmem:[%s3194_s3 + $0x60] sm:$0xff] %v745_v57  ;;  %1493 = vst [vmem:[%s3194_s3 + $0x460] sm:$0xff] %v1065_v58  ;;  %v749_v6 = vadd.f32 %v748_v4, %v2113_v62  ;;  %v1069_v7 = vadd.f32 %v1068_v5, %v2113_v62  ;;  %v750_v8 = vpop.f32.mrb[15].mxu0  ;;  %v1070_v9 = vpop.f32.mrb[15].mxu1 }
  0xf5   :  { %1366 = vst [vmem:[%s3194_s3 + $0x68] sm:$0xff] %v747_v2  ;;  %1494 = vst [vmem:[%s3194_s3 + $0x468] sm:$0xff] %v1067_v3  ;;  %v751_v10 = vadd.f32 %v750_v8, %v2115_v63  ;;  %v1071_v11 = vadd.f32 %v1070_v9, %v2115_v63 }
  0xf6   :  { %1367 = vst [vmem:[%s3194_s3 + $0x70] sm:$0xff] %v749_v6  ;;  %1495 = vst [vmem:[%s3194_s3 + $0x470] sm:$0xff] %v1069_v7  ;;  %1709 = vmatmul.mubr.msk.bf16.gmra.mrb[120].mxu0 %vm487_vm0, %v1809_v61  ;;  %1741 = vmatmul.mubr.msk.bf16.gmra.mrb[120].mxu1 %vm487_vm0, %v1810_v0 }
  0xf7   :  { %1368 = vst [vmem:[%s3194_s3 + $0x78] sm:$0xff] %v751_v10  ;;  %1496 = vst [vmem:[%s3194_s3 + $0x478] sm:$0xff] %v1071_v11  ;;  %1022 = vmatprep.mubr.bf16.mxu0 %v1813_v1  ;;  %1342 = vmatprep.mubr.bf16.mxu1 %v1813_v1 }
  0xf9   :  { %v754_v12 = vpop.f32.mrb[16].mxu0  ;;  %v1074_v13 = vpop.f32.mrb[16].mxu1 }
  0xfa   :  { %v755_v14 = vadd.f32 %v754_v12, %v2113_v62  ;;  %v1075_v15 = vadd.f32 %v1074_v13, %v2113_v62  ;;  %v756_v16 = vpop.f32.mrb[17].mxu0  ;;  %v1076_v17 = vpop.f32.mrb[17].mxu1 }
  0xfb   :  { %v757_v20 = vadd.f32 %v756_v16, %v2115_v63  ;;  %v1077_v1 = vadd.f32 %v1076_v17, %v2115_v63  ;;  %v758_v21 = vpop.f32.mrb[18].mxu0  ;;  %v1078_v22 = vpop.f32.mrb[18].mxu1 }
  0xfc   :  { %1369 = vst [vmem:[%s3194_s3 + $0x80] sm:$0xff] %v755_v14  ;;  %1497 = vst [vmem:[%s3194_s3 + $0x480] sm:$0xff] %v1075_v15  ;;  %v759_v23 = vadd.f32 %v758_v21, %v2113_v62  ;;  %v1079_v24 = vadd.f32 %v1078_v22, %v2113_v62  ;;  %v760_v25 = vpop.f32.mrb[19].mxu0  ;;  %v1080_v26 = vpop.f32.mrb[19].mxu1 }
  0xfd   :  { %1370 = vst [vmem:[%s3194_s3 + $0x88] sm:$0xff] %v757_v20  ;;  %1498 = vst [vmem:[%s3194_s3 + $0x488] sm:$0xff] %v1077_v1  ;;  %v761_v27 = vadd.f32 %v760_v25, %v2115_v63  ;;  %v1081_v28 = vadd.f32 %v1080_v26, %v2115_v63 }
  0xfe   :  { %1371 = vst [vmem:[%s3194_s3 + $0x90] sm:$0xff] %v759_v23  ;;  %1499 = vst [vmem:[%s3194_s3 + $0x490] sm:$0xff] %v1079_v24  ;;  %1710 = vmatmul.mubr.msk.bf16.gmra.mrb[124].mxu0 %vm487_vm0, %v1811_v18  ;;  %1742 = vmatmul.mubr.msk.bf16.gmra.mrb[124].mxu1 %vm487_vm0, %v1812_v19 }
  0xff   :  { %1372 = vst [vmem:[%s3194_s3 + $0x98] sm:$0xff] %v761_v27  ;;  %1500 = vst [vmem:[%s3194_s3 + $0x498] sm:$0xff] %v1081_v28 }
 0x101   :  { %v764_v29 = vpop.f32.mrb[20].mxu0  ;;  %v1084_v30 = vpop.f32.mrb[20].mxu1 }
 0x102   :  { %v765_v31 = vadd.f32 %v764_v29, %v2113_v62  ;;  %v1085_v32 = vadd.f32 %v1084_v30, %v2113_v62  ;;  %v766_v33 = vpop.f32.mrb[21].mxu0  ;;  %v1086_v34 = vpop.f32.mrb[21].mxu1 }
 0x103   :  { %v767_v35 = vadd.f32 %v766_v33, %v2115_v63  ;;  %v1087_v36 = vadd.f32 %v1086_v34, %v2115_v63  ;;  %v768_v37 = vpop.f32.mrb[22].mxu0  ;;  %v1088_v38 = vpop.f32.mrb[22].mxu1 }
 0x104   :  { %1373 = vst [vmem:[%s3194_s3 + $0xa0] sm:$0xff] %v765_v31  ;;  %1501 = vst [vmem:[%s3194_s3 + $0x4a0] sm:$0xff] %v1085_v32  ;;  %v769_v39 = vadd.f32 %v768_v37, %v2113_v62  ;;  %v1089_v40 = vadd.f32 %v1088_v38, %v2113_v62  ;;  %v770_v41 = vpop.f32.mrb[23].mxu0  ;;  %v1090_v42 = vpop.f32.mrb[23].mxu1 }
 0x105   :  { %1374 = vst [vmem:[%s3194_s3 + $0xa8] sm:$0xff] %v767_v35  ;;  %1502 = vst [vmem:[%s3194_s3 + $0x4a8] sm:$0xff] %v1087_v36  ;;  %v771_v43 = vadd.f32 %v770_v41, %v2115_v63  ;;  %v1091_v44 = vadd.f32 %v1090_v42, %v2115_v63 }
 0x106   :  { %1375 = vst [vmem:[%s3194_s3 + $0xb0] sm:$0xff] %v769_v39  ;;  %1503 = vst [vmem:[%s3194_s3 + $0x4b0] sm:$0xff] %v1089_v40 }
 0x107   :  { %1376 = vst [vmem:[%s3194_s3 + $0xb8] sm:$0xff] %v771_v43  ;;  %1504 = vst [vmem:[%s3194_s3 + $0x4b8] sm:$0xff] %v1091_v44 }
 0x109   :  { %v774_v45 = vpop.f32.mrb[24].mxu0  ;;  %v1094_v46 = vpop.f32.mrb[24].mxu1 }
 0x10a   :  { %v775_v47 = vadd.f32 %v774_v45, %v2113_v62  ;;  %v1095_v48 = vadd.f32 %v1094_v46, %v2113_v62  ;;  %v776_v49 = vpop.f32.mrb[25].mxu0  ;;  %v1096_v50 = vpop.f32.mrb[25].mxu1 }
 0x10b   :  { %v777_v51 = vadd.f32 %v776_v49, %v2115_v63  ;;  %v1097_v52 = vadd.f32 %v1096_v50, %v2115_v63  ;;  %v778_v53 = vpop.f32.mrb[26].mxu0  ;;  %v1098_v54 = vpop.f32.mrb[26].mxu1 }
 0x10c   :  { %1377 = vst [vmem:[%s3194_s3 + $0xc0] sm:$0xff] %v775_v47  ;;  %1505 = vst [vmem:[%s3194_s3 + $0x4c0] sm:$0xff] %v1095_v48  ;;  %v779_v55 = vadd.f32 %v778_v53, %v2113_v62  ;;  %v1099_v56 = vadd.f32 %v1098_v54, %v2113_v62  ;;  %v780_v57 = vpop.f32.mrb[27].mxu0  ;;  %v1100_v58 = vpop.f32.mrb[27].mxu1 }
 0x10d   :  { %1378 = vst [vmem:[%s3194_s3 + $0xc8] sm:$0xff] %v777_v51  ;;  %1506 = vst [vmem:[%s3194_s3 + $0x4c8] sm:$0xff] %v1097_v52  ;;  %v781_v59 = vadd.f32 %v780_v57, %v2115_v63  ;;  %v1101_v60 = vadd.f32 %v1100_v58, %v2115_v63 }
 0x10e   :  { %1379 = vst [vmem:[%s3194_s3 + $0xd0] sm:$0xff] %v779_v55  ;;  %1507 = vst [vmem:[%s3194_s3 + $0x4d0] sm:$0xff] %v1099_v56 }
 0x10f   :  { %1380 = vst [vmem:[%s3194_s3 + $0xd8] sm:$0xff] %v781_v59  ;;  %1508 = vst [vmem:[%s3194_s3 + $0x4d8] sm:$0xff] %v1101_v60 }
 0x111   :  { %v784_v61 = vpop.f32.mrb[28].mxu0  ;;  %v1104_v0 = vpop.f32.mrb[28].mxu1 }
 0x112   :  { %v785_v2 = vadd.f32 %v784_v61, %v2113_v62  ;;  %v1105_v3 = vadd.f32 %v1104_v0, %v2113_v62  ;;  %v786_v4 = vpop.f32.mrb[29].mxu0  ;;  %v1106_v5 = vpop.f32.mrb[29].mxu1 }
 0x113   :  { %v787_v6 = vadd.f32 %v786_v4, %v2115_v63  ;;  %v1107_v7 = vadd.f32 %v1106_v5, %v2115_v63  ;;  %v788_v8 = vpop.f32.mrb[30].mxu0  ;;  %v1108_v9 = vpop.f32.mrb[30].mxu1 }
 0x114   :  { %1381 = vst [vmem:[%s3194_s3 + $0xe0] sm:$0xff] %v785_v2  ;;  %1509 = vst [vmem:[%s3194_s3 + $0x4e0] sm:$0xff] %v1105_v3  ;;  %v789_v10 = vadd.f32 %v788_v8, %v2113_v62  ;;  %v1109_v11 = vadd.f32 %v1108_v9, %v2113_v62  ;;  %v790_v12 = vpop.f32.mrb[31].mxu0  ;;  %v1110_v13 = vpop.f32.mrb[31].mxu1 }
 0x115   :  { %1382 = vst [vmem:[%s3194_s3 + $0xe8] sm:$0xff] %v787_v6  ;;  %1510 = vst [vmem:[%s3194_s3 + $0x4e8] sm:$0xff] %v1107_v7  ;;  %v791_v14 = vadd.f32 %v790_v12, %v2115_v63  ;;  %v1111_v15 = vadd.f32 %v1110_v13, %v2115_v63 }
 0x116   :  { %1383 = vst [vmem:[%s3194_s3 + $0xf0] sm:$0xff] %v789_v10  ;;  %1511 = vst [vmem:[%s3194_s3 + $0x4f0] sm:$0xff] %v1109_v11 }
 0x117   :  { %1384 = vst [vmem:[%s3194_s3 + $0xf8] sm:$0xff] %v791_v14  ;;  %1512 = vst [vmem:[%s3194_s3 + $0x4f8] sm:$0xff] %v1111_v15 }
 0x119   :  { %v794_v16 = vpop.f32.mrb[32].mxu0  ;;  %v1114_v17 = vpop.f32.mrb[32].mxu1 }
 0x11a   :  { %v795_v18 = vadd.f32 %v794_v16, %v2113_v62  ;;  %v1115_v19 = vadd.f32 %v1114_v17, %v2113_v62  ;;  %v796_v20 = vpop.f32.mrb[33].mxu0  ;;  %v1116_v1 = vpop.f32.mrb[33].mxu1 }
 0x11b   :  { %v797_v21 = vadd.f32 %v796_v20, %v2115_v63  ;;  %v1117_v22 = vadd.f32 %v1116_v1, %v2115_v63  ;;  %v798_v23 = vpop.f32.mrb[34].mxu0  ;;  %v1118_v24 = vpop.f32.mrb[34].mxu1 }
 0x11c   :  { %1385 = vst [vmem:[%s3194_s3 + $0x100] sm:$0xff] %v795_v18  ;;  %1513 = vst [vmem:[%s3194_s3 + $0x500] sm:$0xff] %v1115_v19  ;;  %v799_v25 = vadd.f32 %v798_v23, %v2113_v62  ;;  %v1119_v26 = vadd.f32 %v1118_v24, %v2113_v62  ;;  %v800_v27 = vpop.f32.mrb[35].mxu0  ;;  %v1120_v28 = vpop.f32.mrb[35].mxu1 }
 0x11d   :  { %1386 = vst [vmem:[%s3194_s3 + $0x108] sm:$0xff] %v797_v21  ;;  %1514 = vst [vmem:[%s3194_s3 + $0x508] sm:$0xff] %v1117_v22  ;;  %v801_v29 = vadd.f32 %v800_v27, %v2115_v63  ;;  %v1121_v30 = vadd.f32 %v1120_v28, %v2115_v63 }
 0x11e   :  { %1387 = vst [vmem:[%s3194_s3 + $0x110] sm:$0xff] %v799_v25  ;;  %1515 = vst [vmem:[%s3194_s3 + $0x510] sm:$0xff] %v1119_v26 }
 0x11f   :  { %1388 = vst [vmem:[%s3194_s3 + $0x118] sm:$0xff] %v801_v29  ;;  %1516 = vst [vmem:[%s3194_s3 + $0x518] sm:$0xff] %v1121_v30 }
 0x121   :  { %v804_v31 = vpop.f32.mrb[36].mxu0  ;;  %v1124_v32 = vpop.f32.mrb[36].mxu1 }
 0x122   :  { %v805_v33 = vadd.f32 %v804_v31, %v2113_v62  ;;  %v1125_v34 = vadd.f32 %v1124_v32, %v2113_v62  ;;  %v806_v35 = vpop.f32.mrb[37].mxu0  ;;  %v1126_v36 = vpop.f32.mrb[37].mxu1 }
 0x123   :  { %v807_v37 = vadd.f32 %v806_v35, %v2115_v63  ;;  %v1127_v38 = vadd.f32 %v1126_v36, %v2115_v63  ;;  %v808_v39 = vpop.f32.mrb[38].mxu0  ;;  %v1128_v40 = vpop.f32.mrb[38].mxu1 }
 0x124   :  { %1389 = vst [vmem:[%s3194_s3 + $0x120] sm:$0xff] %v805_v33  ;;  %1517 = vst [vmem:[%s3194_s3 + $0x520] sm:$0xff] %v1125_v34  ;;  %v809_v41 = vadd.f32 %v808_v39, %v2113_v62  ;;  %v1129_v42 = vadd.f32 %v1128_v40, %v2113_v62  ;;  %v810_v43 = vpop.f32.mrb[39].mxu0  ;;  %v1130_v44 = vpop.f32.mrb[39].mxu1 }
 0x125   :  { %1390 = vst [vmem:[%s3194_s3 + $0x128] sm:$0xff] %v807_v37  ;;  %1518 = vst [vmem:[%s3194_s3 + $0x528] sm:$0xff] %v1127_v38  ;;  %v811_v45 = vadd.f32 %v810_v43, %v2115_v63  ;;  %v1131_v46 = vadd.f32 %v1130_v44, %v2115_v63 }
 0x126   :  { %1391 = vst [vmem:[%s3194_s3 + $0x130] sm:$0xff] %v809_v41  ;;  %1519 = vst [vmem:[%s3194_s3 + $0x530] sm:$0xff] %v1129_v42 }
 0x127   :  { %1392 = vst [vmem:[%s3194_s3 + $0x138] sm:$0xff] %v811_v45  ;;  %1520 = vst [vmem:[%s3194_s3 + $0x538] sm:$0xff] %v1131_v46 }
 0x129   :  { %v814_v47 = vpop.f32.mrb[40].mxu0  ;;  %v1134_v48 = vpop.f32.mrb[40].mxu1 }
 0x12a   :  { %v815_v49 = vadd.f32 %v814_v47, %v2113_v62  ;;  %v1135_v50 = vadd.f32 %v1134_v48, %v2113_v62  ;;  %v816_v51 = vpop.f32.mrb[41].mxu0  ;;  %v1136_v52 = vpop.f32.mrb[41].mxu1 }
 0x12b   :  { %v817_v53 = vadd.f32 %v816_v51, %v2115_v63  ;;  %v1137_v54 = vadd.f32 %v1136_v52, %v2115_v63  ;;  %v818_v55 = vpop.f32.mrb[42].mxu0  ;;  %v1138_v56 = vpop.f32.mrb[42].mxu1 }
 0x12c   :  { %1393 = vst [vmem:[%s3194_s3 + $0x140] sm:$0xff] %v815_v49  ;;  %1521 = vst [vmem:[%s3194_s3 + $0x540] sm:$0xff] %v1135_v50  ;;  %v819_v57 = vadd.f32 %v818_v55, %v2113_v62  ;;  %v1139_v58 = vadd.f32 %v1138_v56, %v2113_v62  ;;  %v820_v59 = vpop.f32.mrb[43].mxu0  ;;  %v1140_v60 = vpop.f32.mrb[43].mxu1 }
 0x12d   :  { %1394 = vst [vmem:[%s3194_s3 + $0x148] sm:$0xff] %v817_v53  ;;  %1522 = vst [vmem:[%s3194_s3 + $0x548] sm:$0xff] %v1137_v54  ;;  %v821_v61 = vadd.f32 %v820_v59, %v2115_v63  ;;  %v1141_v0 = vadd.f32 %v1140_v60, %v2115_v63 }
 0x12e   :  { %1395 = vst [vmem:[%s3194_s3 + $0x150] sm:$0xff] %v819_v57  ;;  %1523 = vst [vmem:[%s3194_s3 + $0x550] sm:$0xff] %v1139_v58 }
 0x12f   :  { %1396 = vst [vmem:[%s3194_s3 + $0x158] sm:$0xff] %v821_v61  ;;  %1524 = vst [vmem:[%s3194_s3 + $0x558] sm:$0xff] %v1141_v0 }
 0x131   :  { %v824_v2 = vpop.f32.mrb[44].mxu0  ;;  %v1144_v3 = vpop.f32.mrb[44].mxu1 }
 0x132   :  { %v825_v4 = vadd.f32 %v824_v2, %v2113_v62  ;;  %v1145_v5 = vadd.f32 %v1144_v3, %v2113_v62  ;;  %v826_v6 = vpop.f32.mrb[45].mxu0  ;;  %v1146_v7 = vpop.f32.mrb[45].mxu1 }
 0x133   :  { %v827_v8 = vadd.f32 %v826_v6, %v2115_v63  ;;  %v1147_v9 = vadd.f32 %v1146_v7, %v2115_v63  ;;  %v828_v10 = vpop.f32.mrb[46].mxu0  ;;  %v1148_v11 = vpop.f32.mrb[46].mxu1 }
 0x134   :  { %1397 = vst [vmem:[%s3194_s3 + $0x160] sm:$0xff] %v825_v4  ;;  %1525 = vst [vmem:[%s3194_s3 + $0x560] sm:$0xff] %v1145_v5  ;;  %v829_v12 = vadd.f32 %v828_v10, %v2113_v62  ;;  %v1149_v13 = vadd.f32 %v1148_v11, %v2113_v62  ;;  %v830_v14 = vpop.f32.mrb[47].mxu0  ;;  %v1150_v15 = vpop.f32.mrb[47].mxu1 }
 0x135   :  { %1398 = vst [vmem:[%s3194_s3 + $0x168] sm:$0xff] %v827_v8  ;;  %1526 = vst [vmem:[%s3194_s3 + $0x568] sm:$0xff] %v1147_v9  ;;  %v831_v16 = vadd.f32 %v830_v14, %v2115_v63  ;;  %v1151_v17 = vadd.f32 %v1150_v15, %v2115_v63 }
 0x136   :  { %1399 = vst [vmem:[%s3194_s3 + $0x170] sm:$0xff] %v829_v12  ;;  %1527 = vst [vmem:[%s3194_s3 + $0x570] sm:$0xff] %v1149_v13 }
 0x137   :  { %1400 = vst [vmem:[%s3194_s3 + $0x178] sm:$0xff] %v831_v16  ;;  %1528 = vst [vmem:[%s3194_s3 + $0x578] sm:$0xff] %v1151_v17 }
 0x139   :  { %v834_v18 = vpop.f32.mrb[48].mxu0  ;;  %v1154_v19 = vpop.f32.mrb[48].mxu1 }
 0x13a   :  { %v835_v20 = vadd.f32 %v834_v18, %v2113_v62  ;;  %v1155_v1 = vadd.f32 %v1154_v19, %v2113_v62  ;;  %v836_v21 = vpop.f32.mrb[49].mxu0  ;;  %v1156_v22 = vpop.f32.mrb[49].mxu1 }
 0x13b   :  { %v837_v23 = vadd.f32 %v836_v21, %v2115_v63  ;;  %v1157_v24 = vadd.f32 %v1156_v22, %v2115_v63  ;;  %v838_v25 = vpop.f32.mrb[50].mxu0  ;;  %v1158_v26 = vpop.f32.mrb[50].mxu1 }
 0x13c   :  { %1401 = vst [vmem:[%s3194_s3 + $0x180] sm:$0xff] %v835_v20  ;;  %1529 = vst [vmem:[%s3194_s3 + $0x580] sm:$0xff] %v1155_v1  ;;  %v839_v27 = vadd.f32 %v838_v25, %v2113_v62  ;;  %v1159_v28 = vadd.f32 %v1158_v26, %v2113_v62  ;;  %v840_v29 = vpop.f32.mrb[51].mxu0  ;;  %v1160_v30 = vpop.f32.mrb[51].mxu1 }
 0x13d   :  { %1402 = vst [vmem:[%s3194_s3 + $0x188] sm:$0xff] %v837_v23  ;;  %1530 = vst [vmem:[%s3194_s3 + $0x588] sm:$0xff] %v1157_v24  ;;  %v841_v31 = vadd.f32 %v840_v29, %v2115_v63  ;;  %v1161_v32 = vadd.f32 %v1160_v30, %v2115_v63 }
 0x13e   :  { %1403 = vst [vmem:[%s3194_s3 + $0x190] sm:$0xff] %v839_v27  ;;  %1531 = vst [vmem:[%s3194_s3 + $0x590] sm:$0xff] %v1159_v28 }
 0x13f   :  { %1404 = vst [vmem:[%s3194_s3 + $0x198] sm:$0xff] %v841_v31  ;;  %1532 = vst [vmem:[%s3194_s3 + $0x598] sm:$0xff] %v1161_v32 }
 0x141   :  { %v844_v33 = vpop.f32.mrb[52].mxu0  ;;  %v1164_v34 = vpop.f32.mrb[52].mxu1 }
 0x142   :  { %v845_v35 = vadd.f32 %v844_v33, %v2113_v62  ;;  %v1165_v36 = vadd.f32 %v1164_v34, %v2113_v62  ;;  %v846_v37 = vpop.f32.mrb[53].mxu0  ;;  %v1166_v38 = vpop.f32.mrb[53].mxu1 }
 0x143   :  { %v847_v39 = vadd.f32 %v846_v37, %v2115_v63  ;;  %v1167_v40 = vadd.f32 %v1166_v38, %v2115_v63  ;;  %v848_v41 = vpop.f32.mrb[54].mxu0  ;;  %v1168_v42 = vpop.f32.mrb[54].mxu1 }
 0x144   :  { %1405 = vst [vmem:[%s3194_s3 + $0x1a0] sm:$0xff] %v845_v35  ;;  %1533 = vst [vmem:[%s3194_s3 + $0x5a0] sm:$0xff] %v1165_v36  ;;  %v849_v43 = vadd.f32 %v848_v41, %v2113_v62  ;;  %v1169_v44 = vadd.f32 %v1168_v42, %v2113_v62  ;;  %v850_v45 = vpop.f32.mrb[55].mxu0  ;;  %v1170_v46 = vpop.f32.mrb[55].mxu1 }
 0x145   :  { %1406 = vst [vmem:[%s3194_s3 + $0x1a8] sm:$0xff] %v847_v39  ;;  %1534 = vst [vmem:[%s3194_s3 + $0x5a8] sm:$0xff] %v1167_v40  ;;  %v851_v47 = vadd.f32 %v850_v45, %v2115_v63  ;;  %v1171_v48 = vadd.f32 %v1170_v46, %v2115_v63 }
 0x146   :  { %1407 = vst [vmem:[%s3194_s3 + $0x1b0] sm:$0xff] %v849_v43  ;;  %1535 = vst [vmem:[%s3194_s3 + $0x5b0] sm:$0xff] %v1169_v44 }
 0x147   :  { %1408 = vst [vmem:[%s3194_s3 + $0x1b8] sm:$0xff] %v851_v47  ;;  %1536 = vst [vmem:[%s3194_s3 + $0x5b8] sm:$0xff] %v1171_v48 }
 0x149   :  { %v854_v49 = vpop.f32.mrb[56].mxu0  ;;  %v1174_v50 = vpop.f32.mrb[56].mxu1 }
 0x14a   :  { %v855_v51 = vadd.f32 %v854_v49, %v2113_v62  ;;  %v1175_v52 = vadd.f32 %v1174_v50, %v2113_v62  ;;  %v856_v53 = vpop.f32.mrb[57].mxu0  ;;  %v1176_v54 = vpop.f32.mrb[57].mxu1 }
 0x14b   :  { %v857_v55 = vadd.f32 %v856_v53, %v2115_v63  ;;  %v1177_v56 = vadd.f32 %v1176_v54, %v2115_v63  ;;  %v858_v57 = vpop.f32.mrb[58].mxu0  ;;  %v1178_v58 = vpop.f32.mrb[58].mxu1 }
 0x14c   :  { %1409 = vst [vmem:[%s3194_s3 + $0x1c0] sm:$0xff] %v855_v51  ;;  %1537 = vst [vmem:[%s3194_s3 + $0x5c0] sm:$0xff] %v1175_v52  ;;  %v859_v59 = vadd.f32 %v858_v57, %v2113_v62  ;;  %v1179_v60 = vadd.f32 %v1178_v58, %v2113_v62  ;;  %v860_v61 = vpop.f32.mrb[59].mxu0  ;;  %v1180_v0 = vpop.f32.mrb[59].mxu1 }
 0x14d   :  { %1410 = vst [vmem:[%s3194_s3 + $0x1c8] sm:$0xff] %v857_v55  ;;  %1538 = vst [vmem:[%s3194_s3 + $0x5c8] sm:$0xff] %v1177_v56  ;;  %v861_v2 = vadd.f32 %v860_v61, %v2115_v63  ;;  %v1181_v3 = vadd.f32 %v1180_v0, %v2115_v63 }
 0x14e   :  { %1411 = vst [vmem:[%s3194_s3 + $0x1d0] sm:$0xff] %v859_v59  ;;  %1539 = vst [vmem:[%s3194_s3 + $0x5d0] sm:$0xff] %v1179_v60 }
 0x14f   :  { %1412 = vst [vmem:[%s3194_s3 + $0x1d8] sm:$0xff] %v861_v2  ;;  %1540 = vst [vmem:[%s3194_s3 + $0x5d8] sm:$0xff] %v1181_v3 }
 0x151   :  { %v864_v4 = vpop.f32.mrb[60].mxu0  ;;  %v1184_v5 = vpop.f32.mrb[60].mxu1 }
 0x152   :  { %v865_v6 = vadd.f32 %v864_v4, %v2113_v62  ;;  %v1185_v7 = vadd.f32 %v1184_v5, %v2113_v62  ;;  %v866_v8 = vpop.f32.mrb[61].mxu0  ;;  %v1186_v9 = vpop.f32.mrb[61].mxu1 }
 0x153   :  { %v867_v10 = vadd.f32 %v866_v8, %v2115_v63  ;;  %v1187_v11 = vadd.f32 %v1186_v9, %v2115_v63  ;;  %v868_v12 = vpop.f32.mrb[62].mxu0  ;;  %v1188_v13 = vpop.f32.mrb[62].mxu1 }
 0x154   :  { %1413 = vst [vmem:[%s3194_s3 + $0x1e0] sm:$0xff] %v865_v6  ;;  %1541 = vst [vmem:[%s3194_s3 + $0x5e0] sm:$0xff] %v1185_v7  ;;  %v869_v14 = vadd.f32 %v868_v12, %v2113_v62  ;;  %v1189_v15 = vadd.f32 %v1188_v13, %v2113_v62  ;;  %v870_v16 = vpop.f32.mrb[63].mxu0  ;;  %v1190_v17 = vpop.f32.mrb[63].mxu1 }
 0x155   :  { %1414 = vst [vmem:[%s3194_s3 + $0x1e8] sm:$0xff] %v867_v10  ;;  %1542 = vst [vmem:[%s3194_s3 + $0x5e8] sm:$0xff] %v1187_v11  ;;  %v871_v18 = vadd.f32 %v870_v16, %v2115_v63  ;;  %v1191_v19 = vadd.f32 %v1190_v17, %v2115_v63 }
 0x156   :  { %1415 = vst [vmem:[%s3194_s3 + $0x1f0] sm:$0xff] %v869_v14  ;;  %1543 = vst [vmem:[%s3194_s3 + $0x5f0] sm:$0xff] %v1189_v15 }
 0x157   :  { %1416 = vst [vmem:[%s3194_s3 + $0x1f8] sm:$0xff] %v871_v18  ;;  %1544 = vst [vmem:[%s3194_s3 + $0x5f8] sm:$0xff] %v1191_v19 }
 0x159   :  { %v874_v20 = vpop.f32.mrb[64].mxu0  ;;  %v1194_v1 = vpop.f32.mrb[64].mxu1 }
 0x15a   :  { %v875_v21 = vadd.f32 %v874_v20, %v2113_v62  ;;  %v1195_v22 = vadd.f32 %v1194_v1, %v2113_v62  ;;  %v876_v23 = vpop.f32.mrb[65].mxu0  ;;  %v1196_v24 = vpop.f32.mrb[65].mxu1 }
 0x15b   :  { %v877_v25 = vadd.f32 %v876_v23, %v2115_v63  ;;  %v1197_v26 = vadd.f32 %v1196_v24, %v2115_v63  ;;  %v878_v27 = vpop.f32.mrb[66].mxu0  ;;  %v1198_v28 = vpop.f32.mrb[66].mxu1 }
 0x15c   :  { %1417 = vst [vmem:[%s3194_s3 + $0x200] sm:$0xff] %v875_v21  ;;  %1545 = vst [vmem:[%s3194_s3 + $0x600] sm:$0xff] %v1195_v22  ;;  %v879_v29 = vadd.f32 %v878_v27, %v2113_v62  ;;  %v1199_v30 = vadd.f32 %v1198_v28, %v2113_v62  ;;  %v880_v31 = vpop.f32.mrb[67].mxu0  ;;  %v1200_v32 = vpop.f32.mrb[67].mxu1 }
 0x15d   :  { %1418 = vst [vmem:[%s3194_s3 + $0x208] sm:$0xff] %v877_v25  ;;  %1546 = vst [vmem:[%s3194_s3 + $0x608] sm:$0xff] %v1197_v26  ;;  %v881_v33 = vadd.f32 %v880_v31, %v2115_v63  ;;  %v1201_v34 = vadd.f32 %v1200_v32, %v2115_v63 }
 0x15e   :  { %1419 = vst [vmem:[%s3194_s3 + $0x210] sm:$0xff] %v879_v29  ;;  %1547 = vst [vmem:[%s3194_s3 + $0x610] sm:$0xff] %v1199_v30 }
 0x15f   :  { %1420 = vst [vmem:[%s3194_s3 + $0x218] sm:$0xff] %v881_v33  ;;  %1548 = vst [vmem:[%s3194_s3 + $0x618] sm:$0xff] %v1201_v34 }
 0x161   :  { %v884_v35 = vpop.f32.mrb[68].mxu0  ;;  %v1204_v36 = vpop.f32.mrb[68].mxu1 }
 0x162   :  { %v885_v37 = vadd.f32 %v884_v35, %v2113_v62  ;;  %v1205_v38 = vadd.f32 %v1204_v36, %v2113_v62  ;;  %v886_v39 = vpop.f32.mrb[69].mxu0  ;;  %v1206_v40 = vpop.f32.mrb[69].mxu1 }
 0x163   :  { %v887_v41 = vadd.f32 %v886_v39, %v2115_v63  ;;  %v1207_v42 = vadd.f32 %v1206_v40, %v2115_v63  ;;  %v888_v43 = vpop.f32.mrb[70].mxu0  ;;  %v1208_v44 = vpop.f32.mrb[70].mxu1 }
 0x164   :  { %1421 = vst [vmem:[%s3194_s3 + $0x220] sm:$0xff] %v885_v37  ;;  %1549 = vst [vmem:[%s3194_s3 + $0x620] sm:$0xff] %v1205_v38  ;;  %v889_v45 = vadd.f32 %v888_v43, %v2113_v62  ;;  %v1209_v46 = vadd.f32 %v1208_v44, %v2113_v62  ;;  %v890_v47 = vpop.f32.mrb[71].mxu0  ;;  %v1210_v48 = vpop.f32.mrb[71].mxu1 }
 0x165   :  { %1422 = vst [vmem:[%s3194_s3 + $0x228] sm:$0xff] %v887_v41  ;;  %1550 = vst [vmem:[%s3194_s3 + $0x628] sm:$0xff] %v1207_v42  ;;  %v891_v49 = vadd.f32 %v890_v47, %v2115_v63  ;;  %v1211_v50 = vadd.f32 %v1210_v48, %v2115_v63 }
 0x166   :  { %1423 = vst [vmem:[%s3194_s3 + $0x230] sm:$0xff] %v889_v45  ;;  %1551 = vst [vmem:[%s3194_s3 + $0x630] sm:$0xff] %v1209_v46 }
 0x167   :  { %1424 = vst [vmem:[%s3194_s3 + $0x238] sm:$0xff] %v891_v49  ;;  %1552 = vst [vmem:[%s3194_s3 + $0x638] sm:$0xff] %v1211_v50 }
 0x169   :  { %v894_v51 = vpop.f32.mrb[72].mxu0  ;;  %v1214_v52 = vpop.f32.mrb[72].mxu1 }
 0x16a   :  { %v895_v53 = vadd.f32 %v894_v51, %v2113_v62  ;;  %v1215_v54 = vadd.f32 %v1214_v52, %v2113_v62  ;;  %v896_v55 = vpop.f32.mrb[73].mxu0  ;;  %v1216_v56 = vpop.f32.mrb[73].mxu1 }
 0x16b   :  { %v897_v57 = vadd.f32 %v896_v55, %v2115_v63  ;;  %v1217_v58 = vadd.f32 %v1216_v56, %v2115_v63  ;;  %v898_v59 = vpop.f32.mrb[74].mxu0  ;;  %v1218_v60 = vpop.f32.mrb[74].mxu1 }
 0x16c   :  { %1425 = vst [vmem:[%s3194_s3 + $0x240] sm:$0xff] %v895_v53  ;;  %1553 = vst [vmem:[%s3194_s3 + $0x640] sm:$0xff] %v1215_v54  ;;  %v899_v61 = vadd.f32 %v898_v59, %v2113_v62  ;;  %v1219_v0 = vadd.f32 %v1218_v60, %v2113_v62  ;;  %v900_v2 = vpop.f32.mrb[75].mxu0  ;;  %v1220_v3 = vpop.f32.mrb[75].mxu1 }
 0x16d   :  { %1426 = vst [vmem:[%s3194_s3 + $0x248] sm:$0xff] %v897_v57  ;;  %1554 = vst [vmem:[%s3194_s3 + $0x648] sm:$0xff] %v1217_v58  ;;  %v901_v4 = vadd.f32 %v900_v2, %v2115_v63  ;;  %v1221_v5 = vadd.f32 %v1220_v3, %v2115_v63 }
 0x16e   :  { %1427 = vst [vmem:[%s3194_s3 + $0x250] sm:$0xff] %v899_v61  ;;  %1555 = vst [vmem:[%s3194_s3 + $0x650] sm:$0xff] %v1219_v0 }
 0x16f   :  { %1428 = vst [vmem:[%s3194_s3 + $0x258] sm:$0xff] %v901_v4  ;;  %1556 = vst [vmem:[%s3194_s3 + $0x658] sm:$0xff] %v1221_v5 }
 0x171   :  { %v904_v6 = vpop.f32.mrb[76].mxu0  ;;  %v1224_v7 = vpop.f32.mrb[76].mxu1 }
 0x172   :  { %v905_v8 = vadd.f32 %v904_v6, %v2113_v62  ;;  %v1225_v9 = vadd.f32 %v1224_v7, %v2113_v62  ;;  %v906_v10 = vpop.f32.mrb[77].mxu0  ;;  %v1226_v11 = vpop.f32.mrb[77].mxu1 }
 0x173   :  { %v907_v12 = vadd.f32 %v906_v10, %v2115_v63  ;;  %v1227_v13 = vadd.f32 %v1226_v11, %v2115_v63  ;;  %v908_v14 = vpop.f32.mrb[78].mxu0  ;;  %v1228_v15 = vpop.f32.mrb[78].mxu1 }
 0x174   :  { %1429 = vst [vmem:[%s3194_s3 + $0x260] sm:$0xff] %v905_v8  ;;  %1557 = vst [vmem:[%s3194_s3 + $0x660] sm:$0xff] %v1225_v9  ;;  %v909_v16 = vadd.f32 %v908_v14, %v2113_v62  ;;  %v1229_v17 = vadd.f32 %v1228_v15, %v2113_v62  ;;  %v910_v18 = vpop.f32.mrb[79].mxu0  ;;  %v1230_v19 = vpop.f32.mrb[79].mxu1 }
 0x175   :  { %1430 = vst [vmem:[%s3194_s3 + $0x268] sm:$0xff] %v907_v12  ;;  %1558 = vst [vmem:[%s3194_s3 + $0x668] sm:$0xff] %v1227_v13  ;;  %v911_v20 = vadd.f32 %v910_v18, %v2115_v63  ;;  %v1231_v1 = vadd.f32 %v1230_v19, %v2115_v63 }
 0x176   :  { %1431 = vst [vmem:[%s3194_s3 + $0x270] sm:$0xff] %v909_v16  ;;  %1559 = vst [vmem:[%s3194_s3 + $0x670] sm:$0xff] %v1229_v17 }
 0x177   :  { %1432 = vst [vmem:[%s3194_s3 + $0x278] sm:$0xff] %v911_v20  ;;  %1560 = vst [vmem:[%s3194_s3 + $0x678] sm:$0xff] %v1231_v1 }
 0x179   :  { %v914_v21 = vpop.f32.mrb[80].mxu0  ;;  %v1234_v22 = vpop.f32.mrb[80].mxu1 }
 0x17a   :  { %v915_v23 = vadd.f32 %v914_v21, %v2113_v62  ;;  %v1235_v24 = vadd.f32 %v1234_v22, %v2113_v62  ;;  %v916_v25 = vpop.f32.mrb[81].mxu0  ;;  %v1236_v26 = vpop.f32.mrb[81].mxu1 }
 0x17b   :  { %v917_v27 = vadd.f32 %v916_v25, %v2115_v63  ;;  %v1237_v28 = vadd.f32 %v1236_v26, %v2115_v63  ;;  %v918_v29 = vpop.f32.mrb[82].mxu0  ;;  %v1238_v30 = vpop.f32.mrb[82].mxu1 }
 0x17c   :  { %1433 = vst [vmem:[%s3194_s3 + $0x280] sm:$0xff] %v915_v23  ;;  %1561 = vst [vmem:[%s3194_s3 + $0x680] sm:$0xff] %v1235_v24  ;;  %v919_v31 = vadd.f32 %v918_v29, %v2113_v62  ;;  %v1239_v32 = vadd.f32 %v1238_v30, %v2113_v62  ;;  %v920_v33 = vpop.f32.mrb[83].mxu0  ;;  %v1240_v34 = vpop.f32.mrb[83].mxu1 }
 0x17d   :  { %1434 = vst [vmem:[%s3194_s3 + $0x288] sm:$0xff] %v917_v27  ;;  %1562 = vst [vmem:[%s3194_s3 + $0x688] sm:$0xff] %v1237_v28  ;;  %v921_v35 = vadd.f32 %v920_v33, %v2115_v63  ;;  %v1241_v36 = vadd.f32 %v1240_v34, %v2115_v63 }
 0x17e   :  { %1435 = vst [vmem:[%s3194_s3 + $0x290] sm:$0xff] %v919_v31  ;;  %1563 = vst [vmem:[%s3194_s3 + $0x690] sm:$0xff] %v1239_v32 }
 0x17f   :  { %1436 = vst [vmem:[%s3194_s3 + $0x298] sm:$0xff] %v921_v35  ;;  %1564 = vst [vmem:[%s3194_s3 + $0x698] sm:$0xff] %v1241_v36 }
 0x181   :  { %v924_v37 = vpop.f32.mrb[84].mxu0  ;;  %v1244_v38 = vpop.f32.mrb[84].mxu1 }
 0x182   :  { %v925_v39 = vadd.f32 %v924_v37, %v2113_v62  ;;  %v1245_v40 = vadd.f32 %v1244_v38, %v2113_v62  ;;  %v926_v41 = vpop.f32.mrb[85].mxu0  ;;  %v1246_v42 = vpop.f32.mrb[85].mxu1 }
 0x183   :  { %v927_v43 = vadd.f32 %v926_v41, %v2115_v63  ;;  %v1247_v44 = vadd.f32 %v1246_v42, %v2115_v63  ;;  %v928_v45 = vpop.f32.mrb[86].mxu0  ;;  %v1248_v46 = vpop.f32.mrb[86].mxu1 }
 0x184   :  { %1437 = vst [vmem:[%s3194_s3 + $0x2a0] sm:$0xff] %v925_v39  ;;  %1565 = vst [vmem:[%s3194_s3 + $0x6a0] sm:$0xff] %v1245_v40  ;;  %v929_v47 = vadd.f32 %v928_v45, %v2113_v62  ;;  %v1249_v48 = vadd.f32 %v1248_v46, %v2113_v62  ;;  %v930_v49 = vpop.f32.mrb[87].mxu0  ;;  %v1250_v50 = vpop.f32.mrb[87].mxu1 }
 0x185   :  { %1438 = vst [vmem:[%s3194_s3 + $0x2a8] sm:$0xff] %v927_v43  ;;  %1566 = vst [vmem:[%s3194_s3 + $0x6a8] sm:$0xff] %v1247_v44  ;;  %v931_v51 = vadd.f32 %v930_v49, %v2115_v63  ;;  %v1251_v52 = vadd.f32 %v1250_v50, %v2115_v63 }
 0x186   :  { %1439 = vst [vmem:[%s3194_s3 + $0x2b0] sm:$0xff] %v929_v47  ;;  %1567 = vst [vmem:[%s3194_s3 + $0x6b0] sm:$0xff] %v1249_v48 }
 0x187   :  { %1440 = vst [vmem:[%s3194_s3 + $0x2b8] sm:$0xff] %v931_v51  ;;  %1568 = vst [vmem:[%s3194_s3 + $0x6b8] sm:$0xff] %v1251_v52 }
 0x189   :  { %v934_v53 = vpop.f32.mrb[88].mxu0  ;;  %v1254_v54 = vpop.f32.mrb[88].mxu1 }
 0x18a   :  { %v935_v55 = vadd.f32 %v934_v53, %v2113_v62  ;;  %v1255_v56 = vadd.f32 %v1254_v54, %v2113_v62  ;;  %v936_v57 = vpop.f32.mrb[89].mxu0  ;;  %v1256_v58 = vpop.f32.mrb[89].mxu1 }
 0x18b   :  { %v937_v59 = vadd.f32 %v936_v57, %v2115_v63  ;;  %v1257_v60 = vadd.f32 %v1256_v58, %v2115_v63  ;;  %v938_v61 = vpop.f32.mrb[90].mxu0  ;;  %v1258_v0 = vpop.f32.mrb[90].mxu1 }
 0x18c   :  { %1441 = vst [vmem:[%s3194_s3 + $0x2c0] sm:$0xff] %v935_v55  ;;  %1569 = vst [vmem:[%s3194_s3 + $0x6c0] sm:$0xff] %v1255_v56  ;;  %v939_v2 = vadd.f32 %v938_v61, %v2113_v62  ;;  %v1259_v3 = vadd.f32 %v1258_v0, %v2113_v62  ;;  %v940_v4 = vpop.f32.mrb[91].mxu0  ;;  %v1260_v5 = vpop.f32.mrb[91].mxu1 }
 0x18d   :  { %1442 = vst [vmem:[%s3194_s3 + $0x2c8] sm:$0xff] %v937_v59  ;;  %1570 = vst [vmem:[%s3194_s3 + $0x6c8] sm:$0xff] %v1257_v60  ;;  %v941_v6 = vadd.f32 %v940_v4, %v2115_v63  ;;  %v1261_v7 = vadd.f32 %v1260_v5, %v2115_v63 }
 0x18e   :  { %1443 = vst [vmem:[%s3194_s3 + $0x2d0] sm:$0xff] %v939_v2  ;;  %1571 = vst [vmem:[%s3194_s3 + $0x6d0] sm:$0xff] %v1259_v3 }
 0x18f   :  { %1444 = vst [vmem:[%s3194_s3 + $0x2d8] sm:$0xff] %v941_v6  ;;  %1572 = vst [vmem:[%s3194_s3 + $0x6d8] sm:$0xff] %v1261_v7 }
 0x191   :  { %v944_v8 = vpop.f32.mrb[92].mxu0  ;;  %v1264_v9 = vpop.f32.mrb[92].mxu1 }
 0x192   :  { %v945_v10 = vadd.f32 %v944_v8, %v2113_v62  ;;  %v1265_v11 = vadd.f32 %v1264_v9, %v2113_v62  ;;  %v946_v12 = vpop.f32.mrb[93].mxu0  ;;  %v1266_v13 = vpop.f32.mrb[93].mxu1 }
 0x193   :  { %v947_v14 = vadd.f32 %v946_v12, %v2115_v63  ;;  %v1267_v15 = vadd.f32 %v1266_v13, %v2115_v63  ;;  %v948_v16 = vpop.f32.mrb[94].mxu0  ;;  %v1268_v17 = vpop.f32.mrb[94].mxu1 }
 0x194   :  { %1445 = vst [vmem:[%s3194_s3 + $0x2e0] sm:$0xff] %v945_v10  ;;  %1573 = vst [vmem:[%s3194_s3 + $0x6e0] sm:$0xff] %v1265_v11  ;;  %v949_v18 = vadd.f32 %v948_v16, %v2113_v62  ;;  %v1269_v19 = vadd.f32 %v1268_v17, %v2113_v62  ;;  %v950_v20 = vpop.f32.mrb[95].mxu0  ;;  %v1270_v1 = vpop.f32.mrb[95].mxu1 }
 0x195   :  { %1446 = vst [vmem:[%s3194_s3 + $0x2e8] sm:$0xff] %v947_v14  ;;  %1574 = vst [vmem:[%s3194_s3 + $0x6e8] sm:$0xff] %v1267_v15  ;;  %v951_v21 = vadd.f32 %v950_v20, %v2115_v63  ;;  %v1271_v22 = vadd.f32 %v1270_v1, %v2115_v63 }
 0x196   :  { %1447 = vst [vmem:[%s3194_s3 + $0x2f0] sm:$0xff] %v949_v18  ;;  %1575 = vst [vmem:[%s3194_s3 + $0x6f0] sm:$0xff] %v1269_v19 }
 0x197   :  { %1448 = vst [vmem:[%s3194_s3 + $0x2f8] sm:$0xff] %v951_v21  ;;  %1576 = vst [vmem:[%s3194_s3 + $0x6f8] sm:$0xff] %v1271_v22 }
 0x199   :  { %v954_v23 = vpop.f32.mrb[96].mxu0  ;;  %v1274_v24 = vpop.f32.mrb[96].mxu1 }
 0x19a   :  { %v955_v25 = vadd.f32 %v954_v23, %v2113_v62  ;;  %v1275_v26 = vadd.f32 %v1274_v24, %v2113_v62  ;;  %v956_v27 = vpop.f32.mrb[97].mxu0  ;;  %v1276_v28 = vpop.f32.mrb[97].mxu1 }
 0x19b   :  { %v957_v29 = vadd.f32 %v956_v27, %v2115_v63  ;;  %v1277_v30 = vadd.f32 %v1276_v28, %v2115_v63  ;;  %v958_v31 = vpop.f32.mrb[98].mxu0  ;;  %v1278_v32 = vpop.f32.mrb[98].mxu1 }
 0x19c   :  { %1449 = vst [vmem:[%s3194_s3 + $0x300] sm:$0xff] %v955_v25  ;;  %1577 = vst [vmem:[%s3194_s3 + $0x700] sm:$0xff] %v1275_v26  ;;  %v959_v33 = vadd.f32 %v958_v31, %v2113_v62  ;;  %v1279_v34 = vadd.f32 %v1278_v32, %v2113_v62  ;;  %v960_v35 = vpop.f32.mrb[99].mxu0  ;;  %v1280_v36 = vpop.f32.mrb[99].mxu1 }
 0x19d   :  { %1450 = vst [vmem:[%s3194_s3 + $0x308] sm:$0xff] %v957_v29  ;;  %1578 = vst [vmem:[%s3194_s3 + $0x708] sm:$0xff] %v1277_v30  ;;  %v961_v37 = vadd.f32 %v960_v35, %v2115_v63  ;;  %v1281_v38 = vadd.f32 %v1280_v36, %v2115_v63 }
 0x19e   :  { %1451 = vst [vmem:[%s3194_s3 + $0x310] sm:$0xff] %v959_v33  ;;  %1579 = vst [vmem:[%s3194_s3 + $0x710] sm:$0xff] %v1279_v34 }
 0x19f   :  { %1452 = vst [vmem:[%s3194_s3 + $0x318] sm:$0xff] %v961_v37  ;;  %1580 = vst [vmem:[%s3194_s3 + $0x718] sm:$0xff] %v1281_v38 }
 0x1a1   :  { %v964_v39 = vpop.f32.mrb[100].mxu0  ;;  %v1284_v40 = vpop.f32.mrb[100].mxu1 }
 0x1a2   :  { %v965_v41 = vadd.f32 %v964_v39, %v2113_v62  ;;  %v1285_v42 = vadd.f32 %v1284_v40, %v2113_v62  ;;  %v966_v43 = vpop.f32.mrb[101].mxu0  ;;  %v1286_v44 = vpop.f32.mrb[101].mxu1 }
 0x1a3   :  { %v967_v45 = vadd.f32 %v966_v43, %v2115_v63  ;;  %v1287_v46 = vadd.f32 %v1286_v44, %v2115_v63  ;;  %v968_v47 = vpop.f32.mrb[102].mxu0  ;;  %v1288_v48 = vpop.f32.mrb[102].mxu1 }
 0x1a4   :  { %1453 = vst [vmem:[%s3194_s3 + $0x320] sm:$0xff] %v965_v41  ;;  %1581 = vst [vmem:[%s3194_s3 + $0x720] sm:$0xff] %v1285_v42  ;;  %v969_v49 = vadd.f32 %v968_v47, %v2113_v62  ;;  %v1289_v50 = vadd.f32 %v1288_v48, %v2113_v62  ;;  %v970_v51 = vpop.f32.mrb[103].mxu0  ;;  %v1290_v52 = vpop.f32.mrb[103].mxu1 }
 0x1a5   :  { %1454 = vst [vmem:[%s3194_s3 + $0x328] sm:$0xff] %v967_v45  ;;  %1582 = vst [vmem:[%s3194_s3 + $0x728] sm:$0xff] %v1287_v46  ;;  %v971_v53 = vadd.f32 %v970_v51, %v2115_v63  ;;  %v1291_v54 = vadd.f32 %v1290_v52, %v2115_v63 }
 0x1a6   :  { %1455 = vst [vmem:[%s3194_s3 + $0x330] sm:$0xff] %v969_v49  ;;  %1583 = vst [vmem:[%s3194_s3 + $0x730] sm:$0xff] %v1289_v50 }
 0x1a7   :  { %1456 = vst [vmem:[%s3194_s3 + $0x338] sm:$0xff] %v971_v53  ;;  %1584 = vst [vmem:[%s3194_s3 + $0x738] sm:$0xff] %v1291_v54 }
 0x1a9   :  { %v974_v55 = vpop.f32.mrb[104].mxu0  ;;  %v1294_v56 = vpop.f32.mrb[104].mxu1 }
 0x1aa   :  { %v975_v57 = vadd.f32 %v974_v55, %v2113_v62  ;;  %v1295_v58 = vadd.f32 %v1294_v56, %v2113_v62  ;;  %v976_v59 = vpop.f32.mrb[105].mxu0  ;;  %v1296_v60 = vpop.f32.mrb[105].mxu1 }
 0x1ab   :  { %v977_v61 = vadd.f32 %v976_v59, %v2115_v63  ;;  %v1297_v0 = vadd.f32 %v1296_v60, %v2115_v63  ;;  %v978_v2 = vpop.f32.mrb[106].mxu0  ;;  %v1298_v3 = vpop.f32.mrb[106].mxu1 }
 0x1ac   :  { %1457 = vst [vmem:[%s3194_s3 + $0x340] sm:$0xff] %v975_v57  ;;  %1585 = vst [vmem:[%s3194_s3 + $0x740] sm:$0xff] %v1295_v58  ;;  %v979_v4 = vadd.f32 %v978_v2, %v2113_v62  ;;  %v1299_v5 = vadd.f32 %v1298_v3, %v2113_v62  ;;  %v980_v6 = vpop.f32.mrb[107].mxu0  ;;  %v1300_v7 = vpop.f32.mrb[107].mxu1 }
 0x1ad   :  { %1458 = vst [vmem:[%s3194_s3 + $0x348] sm:$0xff] %v977_v61  ;;  %1586 = vst [vmem:[%s3194_s3 + $0x748] sm:$0xff] %v1297_v0  ;;  %v981_v8 = vadd.f32 %v980_v6, %v2115_v63  ;;  %v1301_v9 = vadd.f32 %v1300_v7, %v2115_v63 }
 0x1ae   :  { %1459 = vst [vmem:[%s3194_s3 + $0x350] sm:$0xff] %v979_v4  ;;  %1587 = vst [vmem:[%s3194_s3 + $0x750] sm:$0xff] %v1299_v5 }
 0x1af   :  { %1460 = vst [vmem:[%s3194_s3 + $0x358] sm:$0xff] %v981_v8  ;;  %1588 = vst [vmem:[%s3194_s3 + $0x758] sm:$0xff] %v1301_v9 }
 0x1b1   :  { %v984_v10 = vpop.f32.mrb[108].mxu0  ;;  %v1304_v11 = vpop.f32.mrb[108].mxu1 }
 0x1b2   :  { %v985_v12 = vadd.f32 %v984_v10, %v2113_v62  ;;  %v1305_v13 = vadd.f32 %v1304_v11, %v2113_v62  ;;  %v986_v14 = vpop.f32.mrb[109].mxu0  ;;  %v1306_v15 = vpop.f32.mrb[109].mxu1 }
 0x1b3   :  { %v987_v16 = vadd.f32 %v986_v14, %v2115_v63  ;;  %v1307_v17 = vadd.f32 %v1306_v15, %v2115_v63  ;;  %v988_v18 = vpop.f32.mrb[110].mxu0  ;;  %v1308_v19 = vpop.f32.mrb[110].mxu1 }
 0x1b4   :  { %1461 = vst [vmem:[%s3194_s3 + $0x360] sm:$0xff] %v985_v12  ;;  %1589 = vst [vmem:[%s3194_s3 + $0x760] sm:$0xff] %v1305_v13  ;;  %v989_v20 = vadd.f32 %v988_v18, %v2113_v62  ;;  %v1309_v1 = vadd.f32 %v1308_v19, %v2113_v62  ;;  %v990_v21 = vpop.f32.mrb[111].mxu0  ;;  %v1310_v22 = vpop.f32.mrb[111].mxu1 }
 0x1b5   :  { %1462 = vst [vmem:[%s3194_s3 + $0x368] sm:$0xff] %v987_v16  ;;  %1590 = vst [vmem:[%s3194_s3 + $0x768] sm:$0xff] %v1307_v17  ;;  %v991_v23 = vadd.f32 %v990_v21, %v2115_v63  ;;  %v1311_v24 = vadd.f32 %v1310_v22, %v2115_v63 }
 0x1b6   :  { %1463 = vst [vmem:[%s3194_s3 + $0x370] sm:$0xff] %v989_v20  ;;  %1591 = vst [vmem:[%s3194_s3 + $0x770] sm:$0xff] %v1309_v1 }
 0x1b7   :  { %1464 = vst [vmem:[%s3194_s3 + $0x378] sm:$0xff] %v991_v23  ;;  %1592 = vst [vmem:[%s3194_s3 + $0x778] sm:$0xff] %v1311_v24 }
 0x1b9   :  { %v994_v25 = vpop.f32.mrb[112].mxu0  ;;  %v1314_v26 = vpop.f32.mrb[112].mxu1 }
 0x1ba   :  { %v995_v27 = vadd.f32 %v994_v25, %v2113_v62  ;;  %v1315_v28 = vadd.f32 %v1314_v26, %v2113_v62  ;;  %v996_v29 = vpop.f32.mrb[113].mxu0  ;;  %v1316_v30 = vpop.f32.mrb[113].mxu1 }
 0x1bb   :  { %v997_v31 = vadd.f32 %v996_v29, %v2115_v63  ;;  %v1317_v32 = vadd.f32 %v1316_v30, %v2115_v63  ;;  %v998_v33 = vpop.f32.mrb[114].mxu0  ;;  %v1318_v34 = vpop.f32.mrb[114].mxu1 }
 0x1bc   :  { %1465 = vst [vmem:[%s3194_s3 + $0x380] sm:$0xff] %v995_v27  ;;  %1593 = vst [vmem:[%s3194_s3 + $0x780] sm:$0xff] %v1315_v28  ;;  %v999_v35 = vadd.f32 %v998_v33, %v2113_v62  ;;  %v1319_v36 = vadd.f32 %v1318_v34, %v2113_v62  ;;  %v1000_v37 = vpop.f32.mrb[115].mxu0  ;;  %v1320_v38 = vpop.f32.mrb[115].mxu1 }
 0x1bd   :  { %1466 = vst [vmem:[%s3194_s3 + $0x388] sm:$0xff] %v997_v31  ;;  %1594 = vst [vmem:[%s3194_s3 + $0x788] sm:$0xff] %v1317_v32  ;;  %v1001_v39 = vadd.f32 %v1000_v37, %v2115_v63  ;;  %v1321_v40 = vadd.f32 %v1320_v38, %v2115_v63 }
 0x1be   :  { %1467 = vst [vmem:[%s3194_s3 + $0x390] sm:$0xff] %v999_v35  ;;  %1595 = vst [vmem:[%s3194_s3 + $0x790] sm:$0xff] %v1319_v36 }
 0x1bf   :  { %1468 = vst [vmem:[%s3194_s3 + $0x398] sm:$0xff] %v1001_v39  ;;  %1596 = vst [vmem:[%s3194_s3 + $0x798] sm:$0xff] %v1321_v40 }
 0x1c1   :  { %v1004_v41 = vpop.f32.mrb[116].mxu0  ;;  %v1324_v42 = vpop.f32.mrb[116].mxu1 }
 0x1c2   :  { %v1005_v43 = vadd.f32 %v1004_v41, %v2113_v62  ;;  %v1325_v44 = vadd.f32 %v1324_v42, %v2113_v62  ;;  %v1006_v45 = vpop.f32.mrb[117].mxu0  ;;  %v1326_v46 = vpop.f32.mrb[117].mxu1 }
 0x1c3   :  { %v1007_v47 = vadd.f32 %v1006_v45, %v2115_v63  ;;  %v1327_v48 = vadd.f32 %v1326_v46, %v2115_v63  ;;  %v1008_v49 = vpop.f32.mrb[118].mxu0  ;;  %v1328_v50 = vpop.f32.mrb[118].mxu1 }
 0x1c4   :  { %1469 = vst [vmem:[%s3194_s3 + $0x3a0] sm:$0xff] %v1005_v43  ;;  %1597 = vst [vmem:[%s3194_s3 + $0x7a0] sm:$0xff] %v1325_v44  ;;  %v1009_v51 = vadd.f32 %v1008_v49, %v2113_v62  ;;  %v1329_v52 = vadd.f32 %v1328_v50, %v2113_v62  ;;  %v1010_v53 = vpop.f32.mrb[119].mxu0  ;;  %v1330_v54 = vpop.f32.mrb[119].mxu1 }
 0x1c5   :  { %1470 = vst [vmem:[%s3194_s3 + $0x3a8] sm:$0xff] %v1007_v47  ;;  %1598 = vst [vmem:[%s3194_s3 + $0x7a8] sm:$0xff] %v1327_v48  ;;  %v1011_v55 = vadd.f32 %v1010_v53, %v2115_v63  ;;  %v1331_v56 = vadd.f32 %v1330_v54, %v2115_v63 }
 0x1c6   :  { %1471 = vst [vmem:[%s3194_s3 + $0x3b0] sm:$0xff] %v1009_v51  ;;  %1599 = vst [vmem:[%s3194_s3 + $0x7b0] sm:$0xff] %v1329_v52 }
 0x1c7   :  { %1472 = vst [vmem:[%s3194_s3 + $0x3b8] sm:$0xff] %v1011_v55  ;;  %1600 = vst [vmem:[%s3194_s3 + $0x7b8] sm:$0xff] %v1331_v56 }
 0x1c9   :  { %v1014_v57 = vpop.f32.mrb[120].mxu0  ;;  %v1334_v58 = vpop.f32.mrb[120].mxu1 }
 0x1ca   :  { %v1015_v59 = vadd.f32 %v1014_v57, %v2113_v62  ;;  %v1335_v60 = vadd.f32 %v1334_v58, %v2113_v62  ;;  %v1016_v61 = vpop.f32.mrb[121].mxu0  ;;  %v1336_v0 = vpop.f32.mrb[121].mxu1 }
 0x1cb   :  { %v1017_v2 = vadd.f32 %v1016_v61, %v2115_v63  ;;  %v1337_v3 = vadd.f32 %v1336_v0, %v2115_v63  ;;  %v1018_v4 = vpop.f32.mrb[122].mxu0  ;;  %v1338_v5 = vpop.f32.mrb[122].mxu1 }
 0x1cc   :  { %1473 = vst [vmem:[%s3194_s3 + $0x3c0] sm:$0xff] %v1015_v59  ;;  %1601 = vst [vmem:[%s3194_s3 + $0x7c0] sm:$0xff] %v1335_v60  ;;  %v1019_v6 = vadd.f32 %v1018_v4, %v2113_v62  ;;  %v1339_v7 = vadd.f32 %v1338_v5, %v2113_v62  ;;  %v1020_v8 = vpop.f32.mrb[123].mxu0  ;;  %v1340_v9 = vpop.f32.mrb[123].mxu1 }
 0x1cd   :  { %1474 = vst [vmem:[%s3194_s3 + $0x3c8] sm:$0xff] %v1017_v2  ;;  %1602 = vst [vmem:[%s3194_s3 + $0x7c8] sm:$0xff] %v1337_v3  ;;  %v1021_v10 = vadd.f32 %v1020_v8, %v2115_v63  ;;  %v1341_v11 = vadd.f32 %v1340_v9, %v2115_v63 }
 0x1ce   :  { %1475 = vst [vmem:[%s3194_s3 + $0x3d0] sm:$0xff] %v1019_v6  ;;  %1603 = vst [vmem:[%s3194_s3 + $0x7d0] sm:$0xff] %v1339_v7 }
 0x1cf   :  { %1476 = vst [vmem:[%s3194_s3 + $0x3d8] sm:$0xff] %v1021_v10  ;;  %1604 = vst [vmem:[%s3194_s3 + $0x7d8] sm:$0xff] %v1341_v11 }
 0x1d1   :  { %v1024_v12 = vpop.f32.mrb[124].mxu0  ;;  %v1344_v13 = vpop.f32.mrb[124].mxu1 }
 0x1d2   :  { %v1025_v14 = vadd.f32 %v1024_v12, %v2113_v62  ;;  %v1345_v15 = vadd.f32 %v1344_v13, %v2113_v62  ;;  %v1026_v16 = vpop.f32.mrb[125].mxu0  ;;  %v1346_v17 = vpop.f32.mrb[125].mxu1 }
 0x1d3   :  { %v1027_v18 = vadd.f32 %v1026_v16, %v2115_v63  ;;  %v1347_v19 = vadd.f32 %v1346_v17, %v2115_v63  ;;  %v1028_v20 = vpop.f32.mrb[126].mxu0  ;;  %v1348_v1 = vpop.f32.mrb[126].mxu1 }
 0x1d4   :  { %1477 = vst [vmem:[%s3194_s3 + $0x3e0] sm:$0xff] %v1025_v14  ;;  %1605 = vst [vmem:[%s3194_s3 + $0x7e0] sm:$0xff] %v1345_v15  ;;  %v1029_v21 = vadd.f32 %v1028_v20, %v2113_v62  ;;  %v1349_v22 = vadd.f32 %v1348_v1, %v2113_v62  ;;  %v1030_v23 = vpop.f32.mrb[127].mxu0  ;;  %v1350_v24 = vpop.f32.mrb[127].mxu1 }
 0x1d5   :  { %1478 = vst [vmem:[%s3194_s3 + $0x3e8] sm:$0xff] %v1027_v18  ;;  %1606 = vst [vmem:[%s3194_s3 + $0x7e8] sm:$0xff] %v1347_v19  ;;  %v1031_v25 = vadd.f32 %v1030_v23, %v2115_v63  ;;  %v1351_v26 = vadd.f32 %v1350_v24, %v2115_v63 }
 0x1d6   :  { %1479 = vst [vmem:[%s3194_s3 + $0x3f0] sm:$0xff] %v1029_v21  ;;  %1607 = vst [vmem:[%s3194_s3 + $0x7f0] sm:$0xff] %v1349_v22 }
 0x1d7   :  { %1480 = vst [vmem:[%s3194_s3 + $0x3f8] sm:$0xff] %v1031_v25  ;;  %1608 = vst [vmem:[%s3194_s3 + $0x7f8] sm:$0xff] %v1351_v26 }

</bundles_post_ra>
